<compile_context>
chip_gen: v7x
topology: tpu7x:2x2x1
jax: 0.10.0
libtpu: 0.0.40
codegen_flags: <defaults>
</compile_context>

<pallas_src>
import functools
import math

import jax
import jax.numpy as jnp
from jax.experimental import pallas as pl
from jax.experimental.pallas import tpu as pltpu

num_accent_classes = 11

# bf16 MXU inputs (native on v5e/v6e/v7x); accumulation stays f32 everywhere.
MXU_INPUT_DTYPE = jnp.bfloat16
# dtype for non-residual intermediate activations written back to HBM.
ACT_DTYPE = jnp.bfloat16


def _default_vmem_limit():
    # ~3/4 of physical VMEM: 96 MiB on v5e/v6e (128 MiB), 48 MiB on v7x (64 MiB).
    try:
        cap = pltpu.get_tpu_info().vmem_capacity_bytes
    except Exception:
        cap = 64 * 1024 * 1024
    return int(min(cap * 3 // 4, 100 * 1024 * 1024))


_VMEM_LIMIT = _default_vmem_limit()


def _round_up(x, m):
    return (x + m - 1) // m * m


def _pad2(x, rows, cols):
    r, c = x.shape
    if r == rows and c == cols:
        return x
    return jnp.pad(x, ((0, rows - r), (0, cols - c)))


def _erf(x):
    # Abramowitz & Stegun 7.1.26 (|err| < 1.5e-7), built only from Mosaic-supported
    # elementwise ops (abs/div/exp/mul/add/where).
    p = 0.3275911
    a1, a2, a3, a4, a5 = (0.254829592, -0.284496736, 1.421413741,
                          -1.453152027, 1.061405429)
    sgn = jnp.where(x < 0.0, -1.0, 1.0)
    ax = jnp.abs(x)
    t = 1.0 / (1.0 + p * ax)
    poly = ((((a5 * t + a4) * t + a3) * t + a2) * t + a1) * t
    return sgn * (1.0 - poly * jnp.exp(-ax * ax))


def _gelu(x):
    # exact (erf) GELU == torch.nn.functional.gelu default (up to the erf approx above)
    return 0.5 * x * (1.0 + _erf(x * (2.0 ** -0.5)))


# ----------------------- fused tiled linear kernel ---------------------------

def _linear_kernel(*refs, nk, k_actual, k_padded, activation, has_ln, has_res):
    it = iter(refs)
    x_ref = next(it)
    w_ref = next(it)
    b_ref = next(it)
    g_ref = be_ref = r_ref = None
    if has_ln:
        g_ref = next(it)
        be_ref = next(it)
    if has_res:
        r_ref = next(it)
    o_ref = next(it)
    acc_ref = next(it)
    ln_ref = next(it) if has_ln else None

    jstep = pl.program_id(1)
    kstep = pl.program_id(2)

    @pl.when(kstep == 0)
    def _():
        acc_ref[...] = jnp.zeros_like(acc_ref)

    if has_ln:
        # tk == Kp here (nk == 1).  LayerNorm is computed ONCE per row block
        # (j == 0) into VMEM scratch and reused for every output-column tile j.
        # The j grid axis is "arbitrary" so the scratch is valid across j.
        @pl.when(jstep == 0)
        def _():
            x = x_ref[...].astype(jnp.float32)
            inv_k = 1.0 / float(k_actual)
            mu = jnp.sum(x, axis=-1, keepdims=True) * inv_k
            xc = x - mu
            if k_padded:
                col = jax.lax.broadcasted_iota(jnp.int32, x.shape, 1)
                xc = jnp.where(col < k_actual, xc, 0.0)
            var = jnp.sum(xc * xc, axis=-1, keepdims=True) * inv_k
            xn = xc * jax.lax.rsqrt(var + 1e-5) * g_ref[...] + be_ref[...]
            ln_ref[...] = xn.astype(MXU_INPUT_DTYPE)
        xin = ln_ref[...]
    else:
        xin = x_ref[...].astype(MXU_INPUT_DTYPE)

    acc_ref[...] += jnp.dot(xin, w_ref[...].astype(MXU_INPUT_DTYPE),
                            preferred_element_type=jnp.float32)

    @pl.when(kstep == nk - 1)
    def _():
        y = acc_ref[...] + b_ref[...]
        if activation == "gelu":
            y = _gelu(y)
        if has_res:
            y = y + r_ref[...].astype(jnp.float32)
        o_ref[...] = y.astype(o_ref.dtype)


def linear(x, w, b, *, residual=None, ln=None, activation=None,
           out_dtype=jnp.float32, tm=512, tn=512, tk=1024):
    """y = [gelu](layernorm?(x) @ w + b) [+ residual], tiled for the MXU."""
    M, K = x.shape
    _, N = w.shape
    has_ln = ln is not None
    has_res = residual is not None

    tm = min(tm, _round_up(M, 8))
    tn = min(tn, _round_up(N, 128))
    kp_min = _round_up(K, 128)
    tk = kp_min if has_ln else min(tk, kp_min)   # LN prologue needs full row per tile
    Mp, Np, Kp = _round_up(M, tm), _round_up(N, tn), _round_up(K, tk)
    nk = Kp // tk

    args = [_pad2(x, Mp, Kp), _pad2(w, Kp, Np), _pad2(b.reshape(1, N), 1, Np)]
    # TODO(synk): on v5e, add pipeline_mode=pl.Buffered(3) on the weight spec if
    # profiles show exposed DMA after the bf16 / big-tile changes.
    in_specs = [
        pl.BlockSpec((tm, tk), lambda i, j, k: (i, k)),
        pl.BlockSpec((tk, tn), lambda i, j, k: (k, j)),
        pl.BlockSpec((1, tn), lambda i, j, k: (0, j)),
    ]
    if has_ln:
        g, be = ln
        args += [_pad2(g.reshape(1, K), 1, Kp), _pad2(be.reshape(1, K), 1, Kp)]
        in_specs += [pl.BlockSpec((1, tk), lambda i, j, k: (0, k)),
                     pl.BlockSpec((1, tk), lambda i, j, k: (0, k))]
    if has_res:
        args.append(_pad2(residual, Mp, Np))
        in_specs.append(pl.BlockSpec((tm, tn), lambda i, j, k: (i, j)))

    scratch = [pltpu.VMEM((tm, tn), jnp.float32)]
    if has_ln:
        scratch.append(pltpu.VMEM((tm, tk), MXU_INPUT_DTYPE))
        # j must be sequential on one core so the LN scratch (computed at j==0)
        # is valid for j>0.
        dims = ("parallel", "arbitrary", "arbitrary")
    else:
        dims = ("parallel", "parallel", "arbitrary")

    kern = functools.partial(_linear_kernel, nk=nk, k_actual=K,
                             k_padded=(Kp != K), activation=activation,
                             has_ln=has_ln, has_res=has_res)
    out = pl.pallas_call(
        kern,
        grid=(Mp // tm, Np // tn, nk),
        in_specs=in_specs,
        out_specs=pl.BlockSpec((tm, tn), lambda i, j, k: (i, j)),
        out_shape=jax.ShapeDtypeStruct((Mp, Np), out_dtype),
        scratch_shapes=scratch,
        compiler_params=pltpu.CompilerParams(
            dimension_semantics=dims,
            vmem_limit_bytes=_VMEM_LIMIT),
    )(*args)
    if Mp != M or Np != N:
        out = out[:M, :N]
    return out


# ----------------------- lane-dense attention kernel -------------------------
# Activations stay in (B, T, D) layout; K/V for the whole (padded) sequence are
# VMEM-resident per batch element; heads are looped inside the kernel so the
# output tile is D-wide (lane-dense) and no head split/merge HBM transposes are
# needed.  The softmax scale is already folded into the q projection weights.

def _attn_kernel(q_ref, k_ref, v_ref, o_ref, *, n_head, dh, t_actual, need_mask):
    q = q_ref[0]            # (tq, D)
    k = k_ref[0]            # (Tp, D)
    v = v_ref[0]            # (Tp, D)
    outs = []
    for h in range(n_head):                      # static loop over heads
        lo, hi = h * dh, (h + 1) * dh
        qh = q[:, lo:hi].astype(MXU_INPUT_DTYPE)
        kh = k[:, lo:hi].astype(MXU_INPUT_DTYPE)
        vh = v[:, lo:hi].astype(MXU_INPUT_DTYPE)
        s = jax.lax.dot_general(qh, kh, (((1,), (1,)), ((), ())),
                                preferred_element_type=jnp.float32)   # (tq, Tp)
        if need_mask:
            col = jax.lax.broadcasted_iota(jnp.int32, s.shape, 1)
            s = jnp.where(col < t_actual, s, -1e30)
        m = jnp.max(s, axis=-1, keepdims=True)
        p = jnp.exp(s - m)
        l = jnp.sum(p, axis=-1, keepdims=True)
        acc = jnp.dot(p.astype(MXU_INPUT_DTYPE), vh,
                      preferred_element_type=jnp.float32)
        outs.append(acc / l)                     # exact divide (no approx recip)
    o_ref[0] = jnp.concatenate(outs, axis=-1).astype(o_ref.dtype)


def attention(q, k, v, n_head, *, t_blk=256, out_dtype=ACT_DTYPE):
    # q, k, v: (B, T, D); softmax scale folded into q already.
    B, T, D = q.shape
    dh = D // n_head
    t_blk = min(t_blk, _round_up(T, 8))
    Tp = _round_up(T, t_blk)
    if Tp != T:
        pad = ((0, 0), (0, Tp - T), (0, 0))
        q, k, v = jnp.pad(q, pad), jnp.pad(k, pad), jnp.pad(v, pad)

    kern = functools.partial(_attn_kernel, n_head=n_head, dh=dh,
                             t_actual=T, need_mask=(Tp != T))
    out = pl.pallas_call(
        kern,
        grid=(B, Tp // t_blk),
        in_specs=[pl.BlockSpec((1, t_blk, D), lambda b, qi: (b, qi, 0)),
                  pl.BlockSpec((1, Tp, D), lambda b, qi: (b, 0, 0)),
                  pl.BlockSpec((1, Tp, D), lambda b, qi: (b, 0, 0))],
        out_specs=pl.BlockSpec((1, t_blk, D), lambda b, qi: (b, qi, 0)),
        out_shape=jax.ShapeDtypeStruct((B, Tp, D), out_dtype),
        compiler_params=pltpu.CompilerParams(
            dimension_semantics=("parallel", "parallel"),
            vmem_limit_bytes=_VMEM_LIMIT),
    )(q, k, v)
    if Tp != T:
        out = out[:, :T, :]
    return out


# ------------- fused ln_post + mean-pool + accent classifier -----------------

def _pool_cls_kernel(x_ref, g_ref, be_ref, w_ref, b_ref, o_ref, sum_ref, *,
                     t_actual, t_blk, d_actual, need_mask):
    ti = pl.program_id(0)

    @pl.when(ti == 0)
    def _():
        sum_ref[...] = jnp.zeros_like(sum_ref)

    x = x_ref[...].astype(jnp.float32)                 # (B, t_blk, D)
    inv_d = 1.0 / float(d_actual)
    mu = jnp.sum(x, axis=-1, keepdims=True) * inv_d
    xc = x - mu
    var = jnp.sum(xc * xc, axis=-1, keepdims=True) * inv_d
    xn = xc * jax.lax.rsqrt(var + 1e-5) * g_ref[...] + be_ref[...]
    if need_mask:
        row = jax.lax.broadcasted_iota(jnp.int32, xn.shape, 1) + ti * t_blk
        xn = jnp.where(row < t_actual, xn, 0.0)
    sum_ref[...] += jnp.sum(xn, axis=1)                # (B, D)

    @pl.when(ti == pl.num_programs(0) - 1)
    def _():
        pooled = sum_ref[...] * (1.0 / float(t_actual))
        o_ref[...] = jnp.dot(pooled.astype(MXU_INPUT_DTYPE),
                             w_ref[...].astype(MXU_INPUT_DTYPE),
                             preferred_element_type=jnp.float32) + b_ref[...]


def pool_and_classify(x, ln_g, ln_b, w, b, *, t_blk=256):
    B, T, D = x.shape
    C = w.shape[1]
    t_blk = min(t_blk, _round_up(T, 8))
    Tp = _round_up(T, t_blk)
    if Tp != T:
        x = jnp.pad(x, ((0, 0), (0, Tp - T), (0, 0)))
    kern = functools.partial(_pool_cls_kernel, t_actual=T, t_blk=t_blk,
                             d_actual=D, need_mask=(Tp != T))
    return pl.pallas_call(
        kern,
        grid=(Tp // t_blk,),
        in_specs=[pl.BlockSpec((B, t_blk, D), lambda t: (0, t, 0)),
                  pl.BlockSpec((1, 1, D), lambda t: (0, 0, 0)),
                  pl.BlockSpec((1, 1, D), lambda t: (0, 0, 0)),
                  pl.BlockSpec((D, C), lambda t: (0, 0)),
                  pl.BlockSpec((1, C), lambda t: (0, 0))],
        out_specs=pl.BlockSpec((B, C), lambda t: (0, 0)),
        out_shape=jax.ShapeDtypeStruct((B, C), jnp.float32),
        scratch_shapes=[pltpu.VMEM((B, D), jnp.float32)],
        compiler_params=pltpu.CompilerParams(
            dimension_semantics=("arbitrary",),
            vmem_limit_bytes=_VMEM_LIMIT),
    )(x, ln_g.reshape(1, 1, D), ln_b.reshape(1, 1, D), w, b.reshape(1, C))


# --------------------------- JAX glue ----------------------------------------

def conv1d_gelu(x, w, b, stride, out_dtype):
    # x: (B, C_in, T) NCW, w: (C_out, C_in, 3), padding=1 -> (B, T_out, C_out).
    # im2col is XLA glue; the matmul + bias + exact GELU run fused in the Pallas kernel.
    # TODO(synk): fold the 3 taps into the linear kernel as shifted K-blocks to avoid
    # the 3x im2col expansion in HBM (mainly a v5e bandwidth win).
    B, Cin, T = x.shape
    Cout = w.shape[0]
    xp = jnp.pad(x, ((0, 0), (0, 0), (1, 1)))
    T_out = (T + 2 - 3) // stride + 1
    cols = jnp.stack(
        [xp[:, :, kk: kk + stride * (T_out - 1) + 1: stride] for kk in range(3)],
        axis=-1,
    )                                                   # (B, Cin, T_out, 3)
    cols = cols.transpose(0, 2, 1, 3).reshape(B * T_out, Cin * 3)
    wmat = w.reshape(Cout, Cin * 3).T                   # (Cin*3, Cout)
    y = linear(cols, wmat, b, activation="gelu", out_dtype=out_dtype)
    return y.reshape(B, T_out, Cout)                    # channels-last


def sinusoids(length, channels, max_timescale=10000.0):
    log_timescale_increment = math.log(max_timescale) / (channels // 2 - 1)
    inv_timescales = jnp.exp(
        -log_timescale_increment * jnp.arange(channels // 2, dtype=jnp.float32))
    scaled_time = (jnp.arange(length, dtype=jnp.float32)[:, None]
                   * inv_timescales[None, :])
    return jnp.concatenate([jnp.sin(scaled_time), jnp.cos(scaled_time)], axis=1)


def init_params(key, n_mels, n_state, n_layer, n_classes):
    keys = iter(jax.random.split(key, 64))

    def w(shape, scale=0.02):
        return scale * jax.random.normal(next(keys), shape, jnp.float32)

    params = {
        "conv1_w": w((n_state, n_mels, 3)), "conv1_b": w((n_state,)),
        "conv2_w": w((n_state, n_state, 3)), "conv2_b": w((n_state,)),
        "ln_post_g": jnp.ones((n_state,), jnp.float32),
        "ln_post_b": jnp.zeros((n_state,), jnp.float32),
        "cls_w": w((n_state, n_classes)),   # accent_classifier: Linear(n_text_state, 11)
        "cls_b": w((n_classes,)),
        "blocks": [],
    }
    for _ in range(n_layer):
        params["blocks"].append({
            "attn_ln_g": jnp.ones((n_state,), jnp.float32),
            "attn_ln_b": jnp.zeros((n_state,), jnp.float32),
            "wq": w((n_state, n_state)), "bq": w((n_state,)),
            "wk": w((n_state, n_state)),                      # Whisper key proj: no bias
            "wv": w((n_state, n_state)), "bv": w((n_state,)),
            "wo": w((n_state, n_state)), "bo": w((n_state,)),
            "mlp_ln_g": jnp.ones((n_state,), jnp.float32),
            "mlp_ln_b": jnp.zeros((n_state,), jnp.float32),
            "w1": w((n_state, 4 * n_state)), "b1": w((4 * n_state,)),
            "w2": w((4 * n_state, n_state)), "b2": w((n_state,)),
        })
    return params


def modified_whisper_forward(params, mel, tokens, n_head):
    del tokens  # tokens are accepted but unused by ModifiedWhisper.forward
    # ---- conv stem (Conv1d k=3 p=1 + GELU, Conv1d k=3 s=2 p=1 + GELU) ----
    x = conv1d_gelu(mel, params["conv1_w"], params["conv1_b"], stride=1,
                    out_dtype=ACT_DTYPE)
    x = conv1d_gelu(x.transpose(0, 2, 1), params["conv2_w"], params["conv2_b"],
                    stride=2, out_dtype=jnp.float32)
    B, T, D = x.shape
    x = x + sinusoids(T, D)[None]
    H = n_head
    scale = float(D // H) ** -0.5          # Whisper scales q,k by Dh**-0.25 each
    x2 = x.reshape(B * T, D)               # f32 residual stream

    for blk in params["blocks"]:
        # residual attention: fused LN + QKV (one wide matmul; zero K bias;
        # softmax scale folded into the q projection so the kernel never rescales q)
        wqkv = jnp.concatenate([blk["wq"] * scale, blk["wk"], blk["wv"]], axis=1)
        bqkv = jnp.concatenate(
            [blk["bq"] * scale, jnp.zeros((D,), jnp.float32), blk["bv"]], axis=0)
        qkv = linear(x2, wqkv, bqkv, ln=(blk["attn_ln_g"], blk["attn_ln_b"]),
                     out_dtype=ACT_DTYPE)
        q = qkv[:, :D].reshape(B, T, D)
        k = qkv[:, D:2 * D].reshape(B, T, D)
        v = qkv[:, 2 * D:].reshape(B, T, D)
        a = attention(q, k, v, H)                                  # (B, T, D) bf16
        x2 = linear(a.reshape(B * T, D), blk["wo"], blk["bo"],
                    residual=x2, out_dtype=jnp.float32)            # out-proj + residual
        # residual MLP: fused LN + matmul + GELU, then matmul + residual
        h = linear(x2, blk["w1"], blk["b1"],
                   ln=(blk["mlp_ln_g"], blk["mlp_ln_b"]), activation="gelu",
                   out_dtype=ACT_DTYPE)
        x2 = linear(h, blk["w2"], blk["b2"], residual=x2, out_dtype=jnp.float32)

    # fused ln_post + mean over time + accent classifier
    return pool_and_classify(x2.reshape(B, T, D), params["ln_post_g"],
                             params["ln_post_b"], params["cls_w"], params["cls_b"])


if __name__ == "__main__":
    B, n_mels, T_mel = 2, 8, 16               # mel: (batch, n_mels, frames)  [NCW]
    n_state, n_head, n_layer = 32, 4, 2       # small synthetic Whisper dims

    key = jax.random.PRNGKey(0)
    kp, km, kt = jax.random.split(key, 3)
    params = init_params(kp, n_mels, n_state, n_layer, num_accent_classes)
    mel = jax.random.normal(km, (B, n_mels, T_mel), jnp.float32)
    tokens = jax.random.randint(kt, (B, 4), 0, 100)   # unused, kept for signature parity

    fwd = jax.jit(functools.partial(modified_whisper_forward, n_head=n_head))
    out = fwd(params, mel, tokens)
    out = jax.block_until_ready(out)
    assert out.shape == (B, num_accent_classes) and out.dtype == jnp.float32
    print("KERNEL_OK")
</pallas_src>

<mosaic_0001>
module attributes {stable_mosaic.version = 11 : i64} {
  func.func @_linear_kernel(%arg0: i32, %arg1: i32, %arg2: i32, %arg3: memref<32x128xf32, #tpu.memory_space<vmem>>, %arg4: memref<128x128xf32, #tpu.memory_space<vmem>>, %arg5: memref<1x128xf32, #tpu.memory_space<vmem>>, %arg6: memref<32x128xbf16, #tpu.memory_space<vmem>>, %arg7: memref<32x128xf32, #tpu.memory_space<vmem>>) attributes {dimension_semantics = [#tpu.dimension_semantics<parallel>, #tpu.dimension_semantics<parallel>, #tpu.dimension_semantics<arbitrary>], iteration_bounds = array<i64: 1, 1, 1>, scalar_prefetch = 0 : i64, scratch_operands = 1 : i64, tpu.core_type = #tpu.core_type<tc>, window_params = [{transform_indices = @transform_0, window_bounds = array<i64: 32, 128>}, {transform_indices = @transform_1, window_bounds = array<i64: 128, 128>}, {transform_indices = @transform_2, window_bounds = array<i64: 1, 128>}, {transform_indices = @transform_3, window_bounds = array<i64: 32, 128>}]} {
    %c0_i32 = arith.constant 0 : i32
    %0 = arith.cmpi eq, %arg2, %c0_i32 : i32
    %1 = arith.extui %0 : i1 to i32
    %c0_i32_0 = arith.constant 0 : i32
    %2 = arith.cmpi ne, %1, %c0_i32_0 : i32
    scf.if %2 {
      %cst_10 = arith.constant 0.000000e+00 : f32
      %14 = vector.broadcast %cst_10 : f32 to vector<32x128xf32>
      %c0_11 = arith.constant 0 : index
      %c0_12 = arith.constant 0 : index
      %15 = vector.load %arg7[%c0_11, %c0_12] : memref<32x128xf32, #tpu.memory_space<vmem>>, vector<32x128xf32>
      tpu.vector_store %arg7[%c0_11, %c0_12], %14 {strides = array<i32>} : memref<32x128xf32, #tpu.memory_space<vmem>>, vector<32x128xf32>,
    } else {
    }
    %c0 = arith.constant 0 : index
    %c0_1 = arith.constant 0 : index
    %3 = vector.load %arg3[%c0, %c0_1] : memref<32x128xf32, #tpu.memory_space<vmem>>, vector<32x128xf32>
    %4 = arith.truncf %3 : vector<32x128xf32> to vector<32x128xbf16>
    %c0_2 = arith.constant 0 : index
    %c0_3 = arith.constant 0 : index
    %5 = vector.load %arg7[%c0_2, %c0_3] : memref<32x128xf32, #tpu.memory_space<vmem>>, vector<32x128xf32>
    %c0_4 = arith.constant 0 : index
    %c0_5 = arith.constant 0 : index
    %6 = vector.load %arg4[%c0_4, %c0_5] : memref<128x128xf32, #tpu.memory_space<vmem>>, vector<128x128xf32>
    %7 = arith.truncf %6 : vector<128x128xf32> to vector<128x128xbf16>
    %cst = arith.constant dense<0.000000e+00> : vector<32x128xf32>
    %8 = tpu.matmul %4, %7, %cst {dimension_numbers = #tpu.dot_dimension_numbers<[1], [0], [0], [1], [0, 0, 1, 1], [], []>} : vector<32x128xbf16>, vector<128x128xbf16>, vector<32x128xf32> -> vector<32x128xf32>
    %9 = arith.addf %5, %8 : vector<32x128xf32>
    %c0_6 = arith.constant 0 : index
    %c0_7 = arith.constant 0 : index
    %10 = vector.load %arg7[%c0_6, %c0_7] : memref<32x128xf32, #tpu.memory_space<vmem>>, vector<32x128xf32>
    tpu.vector_store %arg7[%c0_6, %c0_7], %9 {strides = array<i32>} : memref<32x128xf32, #tpu.memory_space<vmem>>, vector<32x128xf32>,
    %c0_i32_8 = arith.constant 0 : i32
    %11 = arith.cmpi eq, %arg2, %c0_i32_8 : i32
    %12 = arith.extui %11 : i1 to i32
    %c0_i32_9 = arith.constant 0 : i32
    %13 = arith.cmpi ne, %12, %c0_i32_9 : i32
    scf.if %13 {
      %c0_10 = arith.constant 0 : index
      %c0_11 = arith.constant 0 : index
      %14 = vector.load %arg7[%c0_10, %c0_11] : memref<32x128xf32, #tpu.memory_space<vmem>>, vector<32x128xf32>
      %c0_12 = arith.constant 0 : index
      %c0_13 = arith.constant 0 : index
      %15 = vector.load %arg5[%c0_12, %c0_13] : memref<1x128xf32, #tpu.memory_space<vmem>>, vector<1x128xf32>
      %16 = vector.broadcast %15 : vector<1x128xf32> to vector<32x128xf32>
      %17 = arith.addf %14, %16 : vector<32x128xf32>
      %cst_14 = arith.constant 5.000000e-01 : f32
      %18 = vector.broadcast %cst_14 : f32 to vector<32x128xf32>
      %19 = arith.mulf %18, %17 : vector<32x128xf32>
      %cst_15 = arith.constant 0.707106769 : f32
      %20 = vector.broadcast %cst_15 : f32 to vector<32x128xf32>
      %21 = arith.mulf %17, %20 : vector<32x128xf32>
      %cst_16 = arith.constant 0.000000e+00 : f32
      %22 = vector.broadcast %cst_16 : f32 to vector<32x128xf32>
      %23 = arith.cmpf olt, %21, %22 : vector<32x128xf32>
      %cst_17 = arith.constant -1.000000e+00 : f32
      %cst_18 = arith.constant 1.000000e+00 : f32
      %24 = vector.broadcast %cst_17 : f32 to vector<32x128xf32>
      %25 = vector.broadcast %cst_18 : f32 to vector<32x128xf32>
      %26 = arith.select %23, %24, %25 : vector<32x128xi1>, vector<32x128xf32>
      %27 = math.absf %21 : vector<32x128xf32>
      %cst_19 = arith.constant 0.327591091 : f32
      %28 = vector.broadcast %cst_19 : f32 to vector<32x128xf32>
      %29 = arith.mulf %28, %27 : vector<32x128xf32>
      %cst_20 = arith.constant 1.000000e+00 : f32
      %30 = vector.broadcast %cst_20 : f32 to vector<32x128xf32>
      %31 = arith.addf %30, %29 : vector<32x128xf32>
      %cst_21 = arith.constant 1.000000e+00 : f32
      %32 = vector.broadcast %cst_21 : f32 to vector<32x128xf32>
      %33 = arith.divf %32, %31 : vector<32x128xf32>
      %cst_22 = arith.constant 1.06140542 : f32
      %34 = vector.broadcast %cst_22 : f32 to vector<32x128xf32>
      %35 = arith.mulf %34, %33 : vector<32x128xf32>
      %cst_23 = arith.constant -1.45315206 : f32
      %36 = vector.broadcast %cst_23 : f32 to vector<32x128xf32>
      %37 = arith.addf %35, %36 : vector<32x128xf32>
      %38 = arith.mulf %37, %33 : vector<32x128xf32>
      %cst_24 = arith.constant 1.42141378 : f32
      %39 = vector.broadcast %cst_24 : f32 to vector<32x128xf32>
      %40 = arith.addf %38, %39 : vector<32x128xf32>
      %41 = arith.mulf %40, %33 : vector<32x128xf32>
      %cst_25 = arith.constant -0.284496725 : f32
      %42 = vector.broadcast %cst_25 : f32 to vector<32x128xf32>
      %43 = arith.addf %41, %42 : vector<32x128xf32>
      %44 = arith.mulf %43, %33 : vector<32x128xf32>
      %cst_26 = arith.constant 0.254829586 : f32
      %45 = vector.broadcast %cst_26 : f32 to vector<32x128xf32>
      %46 = arith.addf %44, %45 : vector<32x128xf32>
      %47 = arith.mulf %46, %33 : vector<32x128xf32>
      %cst_27 = arith.constant 0.000000e+00 : f32
      %48 = vector.broadcast %cst_27 : f32 to vector<32x128xf32>
      %49 = arith.subf %48, %27 : vector<32x128xf32>
      %50 = arith.mulf %49, %27 : vector<32x128xf32>
      %51 = math.exp %50 : vector<32x128xf32>
      %52 = arith.mulf %47, %51 : vector<32x128xf32>
      %cst_28 = arith.constant 1.000000e+00 : f32
      %53 = vector.broadcast %cst_28 : f32 to vector<32x128xf32>
      %54 = arith.subf %53, %52 : vector<32x128xf32>
      %55 = arith.mulf %26, %54 : vector<32x128xf32>
      %cst_29 = arith.constant 1.000000e+00 : f32
      %56 = vector.broadcast %cst_29 : f32 to vector<32x128xf32>
      %57 = arith.addf %56, %55 : vector<32x128xf32>
      %58 = arith.mulf %19, %57 : vector<32x128xf32>
      %59 = arith.truncf %58 : vector<32x128xf32> to vector<32x128xbf16>
      %c0_30 = arith.constant 0 : index
      %c0_31 = arith.constant 0 : index
      %60 = vector.load %arg6[%c0_30, %c0_31] : memref<32x128xbf16, #tpu.memory_space<vmem>>, vector<32x128xbf16>
      tpu.vector_store %arg6[%c0_30, %c0_31], %59 {strides = array<i32>} : memref<32x128xbf16, #tpu.memory_space<vmem>>, vector<32x128xbf16>,
    } else {
    }
    return
  }
  func.func @transform_0(%arg0: i32, %arg1: i32, %arg2: i32) -> (i32, i32) {
    %c0_i32 = arith.constant 0 : i32
    return %arg0, %arg2 : i32, i32
  }
  func.func @transform_1(%arg0: i32, %arg1: i32, %arg2: i32) -> (i32, i32) {
    %c0_i32 = arith.constant 0 : i32
    return %arg2, %arg1 : i32, i32
  }
  func.func @transform_2(%arg0: i32, %arg1: i32, %arg2: i32) -> (i32, i32) {
    %c0_i32 = arith.constant 0 : i32
    %c0_i32_0 = arith.constant 0 : i32
    return %c0_i32, %arg1 : i32, i32
  }
  func.func @transform_3(%arg0: i32, %arg1: i32, %arg2: i32) -> (i32, i32) {
    %c0_i32 = arith.constant 0 : i32
    return %arg0, %arg1 : i32, i32
  }
}

module attributes {stable_mosaic.version = 11 : i64} {
  func.func @_linear_kernel(%arg0: i32, %arg1: i32, %arg2: i32, %arg3: memref<16x128xbf16, #tpu.memory_space<vmem>>, %arg4: memref<128x128xf32, #tpu.memory_space<vmem>>, %arg5: memref<1x128xf32, #tpu.memory_space<vmem>>, %arg6: memref<16x128xf32, #tpu.memory_space<vmem>>, %arg7: memref<16x128xf32, #tpu.memory_space<vmem>>) attributes {dimension_semantics = [#tpu.dimension_semantics<parallel>, #tpu.dimension_semantics<parallel>, #tpu.dimension_semantics<arbitrary>], iteration_bounds = array<i64: 1, 1, 1>, scalar_prefetch = 0 : i64, scratch_operands = 1 : i64, tpu.core_type = #tpu.core_type<tc>, window_params = [{transform_indices = @transform_0, window_bounds = array<i64: 16, 128>}, {transform_indices = @transform_1, window_bounds = array<i64: 128, 128>}, {transform_indices = @transform_2, window_bounds = array<i64: 1, 128>}, {transform_indices = @transform_3, window_bounds = array<i64: 16, 128>}]} {
    %c0_i32 = arith.constant 0 : i32
    %0 = arith.cmpi eq, %arg2, %c0_i32 : i32
    %1 = arith.extui %0 : i1 to i32
    %c0_i32_0 = arith.constant 0 : i32
    %2 = arith.cmpi ne, %1, %c0_i32_0 : i32
    scf.if %2 {
      %cst_10 = arith.constant 0.000000e+00 : f32
      %13 = vector.broadcast %cst_10 : f32 to vector<16x128xf32>
      %c0_11 = arith.constant 0 : index
      %c0_12 = arith.constant 0 : index
      %14 = vector.load %arg7[%c0_11, %c0_12] : memref<16x128xf32, #tpu.memory_space<vmem>>, vector<16x128xf32>
      tpu.vector_store %arg7[%c0_11, %c0_12], %13 {strides = array<i32>} : memref<16x128xf32, #tpu.memory_space<vmem>>, vector<16x128xf32>,
    } else {
    }
    %c0 = arith.constant 0 : index
    %c0_1 = arith.constant 0 : index
    %3 = vector.load %arg3[%c0, %c0_1] : memref<16x128xbf16, #tpu.memory_space<vmem>>, vector<16x128xbf16>
    %c0_2 = arith.constant 0 : index
    %c0_3 = arith.constant 0 : index
    %4 = vector.load %arg7[%c0_2, %c0_3] : memref<16x128xf32, #tpu.memory_space<vmem>>, vector<16x128xf32>
    %c0_4 = arith.constant 0 : index
    %c0_5 = arith.constant 0 : index
    %5 = vector.load %arg4[%c0_4, %c0_5] : memref<128x128xf32, #tpu.memory_space<vmem>>, vector<128x128xf32>
    %6 = arith.truncf %5 : vector<128x128xf32> to vector<128x128xbf16>
    %cst = arith.constant dense<0.000000e+00> : vector<16x128xf32>
    %7 = tpu.matmul %3, %6, %cst {dimension_numbers = #tpu.dot_dimension_numbers<[1], [0], [0], [1], [0, 0, 1, 1], [], []>} : vector<16x128xbf16>, vector<128x128xbf16>, vector<16x128xf32> -> vector<16x128xf32>
    %8 = arith.addf %4, %7 : vector<16x128xf32>
    %c0_6 = arith.constant 0 : index
    %c0_7 = arith.constant 0 : index
    %9 = vector.load %arg7[%c0_6, %c0_7] : memref<16x128xf32, #tpu.memory_space<vmem>>, vector<16x128xf32>
    tpu.vector_store %arg7[%c0_6, %c0_7], %8 {strides = array<i32>} : memref<16x128xf32, #tpu.memory_space<vmem>>, vector<16x128xf32>,
    %c0_i32_8 = arith.constant 0 : i32
    %10 = arith.cmpi eq, %arg2, %c0_i32_8 : i32
    %11 = arith.extui %10 : i1 to i32
    %c0_i32_9 = arith.constant 0 : i32
    %12 = arith.cmpi ne, %11, %c0_i32_9 : i32
    scf.if %12 {
      %c0_10 = arith.constant 0 : index
      %c0_11 = arith.constant 0 : index
      %13 = vector.load %arg7[%c0_10, %c0_11] : memref<16x128xf32, #tpu.memory_space<vmem>>, vector<16x128xf32>
      %c0_12 = arith.constant 0 : index
      %c0_13 = arith.constant 0 : index
      %14 = vector.load %arg5[%c0_12, %c0_13] : memref<1x128xf32, #tpu.memory_space<vmem>>, vector<1x128xf32>
      %15 = vector.broadcast %14 : vector<1x128xf32> to vector<16x128xf32>
      %16 = arith.addf %13, %15 : vector<16x128xf32>
      %cst_14 = arith.constant 5.000000e-01 : f32
      %17 = vector.broadcast %cst_14 : f32 to vector<16x128xf32>
      %18 = arith.mulf %17, %16 : vector<16x128xf32>
      %cst_15 = arith.constant 0.707106769 : f32
      %19 = vector.broadcast %cst_15 : f32 to vector<16x128xf32>
      %20 = arith.mulf %16, %19 : vector<16x128xf32>
      %cst_16 = arith.constant 0.000000e+00 : f32
      %21 = vector.broadcast %cst_16 : f32 to vector<16x128xf32>
      %22 = arith.cmpf olt, %20, %21 : vector<16x128xf32>
      %cst_17 = arith.constant -1.000000e+00 : f32
      %cst_18 = arith.constant 1.000000e+00 : f32
      %23 = vector.broadcast %cst_17 : f32 to vector<16x128xf32>
      %24 = vector.broadcast %cst_18 : f32 to vector<16x128xf32>
      %25 = arith.select %22, %23, %24 : vector<16x128xi1>, vector<16x128xf32>
      %26 = math.absf %20 : vector<16x128xf32>
      %cst_19 = arith.constant 0.327591091 : f32
      %27 = vector.broadcast %cst_19 : f32 to vector<16x128xf32>
      %28 = arith.mulf %27, %26 : vector<16x128xf32>
      %cst_20 = arith.constant 1.000000e+00 : f32
      %29 = vector.broadcast %cst_20 : f32 to vector<16x128xf32>
      %30 = arith.addf %29, %28 : vector<16x128xf32>
      %cst_21 = arith.constant 1.000000e+00 : f32
      %31 = vector.broadcast %cst_21 : f32 to vector<16x128xf32>
      %32 = arith.divf %31, %30 : vector<16x128xf32>
      %cst_22 = arith.constant 1.06140542 : f32
      %33 = vector.broadcast %cst_22 : f32 to vector<16x128xf32>
      %34 = arith.mulf %33, %32 : vector<16x128xf32>
      %cst_23 = arith.constant -1.45315206 : f32
      %35 = vector.broadcast %cst_23 : f32 to vector<16x128xf32>
      %36 = arith.addf %34, %35 : vector<16x128xf32>
      %37 = arith.mulf %36, %32 : vector<16x128xf32>
      %cst_24 = arith.constant 1.42141378 : f32
      %38 = vector.broadcast %cst_24 : f32 to vector<16x128xf32>
      %39 = arith.addf %37, %38 : vector<16x128xf32>
      %40 = arith.mulf %39, %32 : vector<16x128xf32>
      %cst_25 = arith.constant -0.284496725 : f32
      %41 = vector.broadcast %cst_25 : f32 to vector<16x128xf32>
      %42 = arith.addf %40, %41 : vector<16x128xf32>
      %43 = arith.mulf %42, %32 : vector<16x128xf32>
      %cst_26 = arith.constant 0.254829586 : f32
      %44 = vector.broadcast %cst_26 : f32 to vector<16x128xf32>
      %45 = arith.addf %43, %44 : vector<16x128xf32>
      %46 = arith.mulf %45, %32 : vector<16x128xf32>
      %cst_27 = arith.constant 0.000000e+00 : f32
      %47 = vector.broadcast %cst_27 : f32 to vector<16x128xf32>
      %48 = arith.subf %47, %26 : vector<16x128xf32>
      %49 = arith.mulf %48, %26 : vector<16x128xf32>
      %50 = math.exp %49 : vector<16x128xf32>
      %51 = arith.mulf %46, %50 : vector<16x128xf32>
      %cst_28 = arith.constant 1.000000e+00 : f32
      %52 = vector.broadcast %cst_28 : f32 to vector<16x128xf32>
      %53 = arith.subf %52, %51 : vector<16x128xf32>
      %54 = arith.mulf %25, %53 : vector<16x128xf32>
      %cst_29 = arith.constant 1.000000e+00 : f32
      %55 = vector.broadcast %cst_29 : f32 to vector<16x128xf32>
      %56 = arith.addf %55, %54 : vector<16x128xf32>
      %57 = arith.mulf %18, %56 : vector<16x128xf32>
      %c0_30 = arith.constant 0 : index
      %c0_31 = arith.constant 0 : index
      %58 = vector.load %arg6[%c0_30, %c0_31] : memref<16x128xf32, #tpu.memory_space<vmem>>, vector<16x128xf32>
      tpu.vector_store %arg6[%c0_30, %c0_31], %57 {strides = array<i32>} : memref<16x128xf32, #tpu.memory_space<vmem>>, vector<16x128xf32>,
    } else {
    }
    return
  }
  func.func @transform_0(%arg0: i32, %arg1: i32, %arg2: i32) -> (i32, i32) {
    %c0_i32 = arith.constant 0 : i32
    return %arg0, %arg2 : i32, i32
  }
  func.func @transform_1(%arg0: i32, %arg1: i32, %arg2: i32) -> (i32, i32) {
    %c0_i32 = arith.constant 0 : i32
    return %arg2, %arg1 : i32, i32
  }
  func.func @transform_2(%arg0: i32, %arg1: i32, %arg2: i32) -> (i32, i32) {
    %c0_i32 = arith.constant 0 : i32
    %c0_i32_0 = arith.constant 0 : i32
    return %c0_i32, %arg1 : i32, i32
  }
  func.func @transform_3(%arg0: i32, %arg1: i32, %arg2: i32) -> (i32, i32) {
    %c0_i32 = arith.constant 0 : i32
    return %arg0, %arg1 : i32, i32
  }
}

module attributes {stable_mosaic.version = 11 : i64} {
  func.func @_linear_kernel(%arg0: i32, %arg1: i32, %arg2: i32, %arg3: memref<16x128xf32, #tpu.memory_space<vmem>>, %arg4: memref<128x128xf32, #tpu.memory_space<vmem>>, %arg5: memref<1x128xf32, #tpu.memory_space<vmem>>, %arg6: memref<1x128xf32, #tpu.memory_space<vmem>>, %arg7: memref<1x128xf32, #tpu.memory_space<vmem>>, %arg8: memref<16x128xbf16, #tpu.memory_space<vmem>>, %arg9: memref<16x128xf32, #tpu.memory_space<vmem>>, %arg10: memref<16x128xbf16, #tpu.memory_space<vmem>>) attributes {dimension_semantics = [#tpu.dimension_semantics<parallel>, #tpu.dimension_semantics<arbitrary>, #tpu.dimension_semantics<arbitrary>], iteration_bounds = array<i64: 1, 1, 1>, scalar_prefetch = 0 : i64, scratch_operands = 2 : i64, tpu.core_type = #tpu.core_type<tc>, window_params = [{transform_indices = @transform_0, window_bounds = array<i64: 16, 128>}, {transform_indices = @transform_1, window_bounds = array<i64: 128, 128>}, {transform_indices = @transform_2, window_bounds = array<i64: 1, 128>}, {transform_indices = @transform_3, window_bounds = array<i64: 1, 128>}, {transform_indices = @transform_4, window_bounds = array<i64: 1, 128>}, {transform_indices = @transform_5, window_bounds = array<i64: 16, 128>}]} {
    %c0_i32 = arith.constant 0 : i32
    %0 = arith.cmpi eq, %arg2, %c0_i32 : i32
    %1 = arith.extui %0 : i1 to i32
    %c0_i32_0 = arith.constant 0 : i32
    %2 = arith.cmpi ne, %1, %c0_i32_0 : i32
    scf.if %2 {
      %cst_12 = arith.constant 0.000000e+00 : f32
      %16 = vector.broadcast %cst_12 : f32 to vector<16x128xf32>
      %c0_13 = arith.constant 0 : index
      %c0_14 = arith.constant 0 : index
      %17 = vector.load %arg9[%c0_13, %c0_14] : memref<16x128xf32, #tpu.memory_space<vmem>>, vector<16x128xf32>
      tpu.vector_store %arg9[%c0_13, %c0_14], %16 {strides = array<i32>} : memref<16x128xf32, #tpu.memory_space<vmem>>, vector<16x128xf32>,
    } else {
    }
    %c0_i32_1 = arith.constant 0 : i32
    %3 = arith.cmpi eq, %arg1, %c0_i32_1 : i32
    %4 = arith.extui %3 : i1 to i32
    %c0_i32_2 = arith.constant 0 : i32
    %5 = arith.cmpi ne, %4, %c0_i32_2 : i32
    scf.if %5 {
      %c0_12 = arith.constant 0 : index
      %c0_13 = arith.constant 0 : index
      %16 = vector.load %arg3[%c0_12, %c0_13] : memref<16x128xf32, #tpu.memory_space<vmem>>, vector<16x128xf32>
      %cst_14 = arith.constant dense<0.000000e+00> : vector<16xf32>
      %17 = vector.multi_reduction <add>, %16, %cst_14 [1] : vector<16x128xf32> to vector<16xf32>
      %18 = vector.shape_cast %17 : vector<16xf32> to vector<16x1xf32>
      %cst_15 = arith.constant 3.125000e-02 : f32
      %19 = vector.broadcast %cst_15 : f32 to vector<16x1xf32>
      %20 = arith.mulf %18, %19 : vector<16x1xf32>
      %21 = vector.broadcast %20 : vector<16x1xf32> to vector<16x128xf32>
      %22 = arith.subf %16, %21 : vector<16x128xf32>
      %23 = tpu.iota {dimensions = array<i32: 1>} : vector<16x128xi32>
      %c32_i32 = arith.constant 32 : i32
      %24 = vector.broadcast %c32_i32 : i32 to vector<16x128xi32>
      %25 = arith.cmpi slt, %23, %24 : vector<16x128xi32>
      %cst_16 = arith.constant 0.000000e+00 : f32
      %26 = vector.broadcast %cst_16 : f32 to vector<16x128xf32>
      %27 = arith.select %25, %22, %26 : vector<16x128xi1>, vector<16x128xf32>
      %28 = arith.mulf %27, %27 : vector<16x128xf32>
      %cst_17 = arith.constant dense<0.000000e+00> : vector<16xf32>
      %29 = vector.multi_reduction <add>, %28, %cst_17 [1] : vector<16x128xf32> to vector<16xf32>
      %30 = vector.shape_cast %29 : vector<16xf32> to vector<16x1xf32>
      %cst_18 = arith.constant 3.125000e-02 : f32
      %31 = vector.broadcast %cst_18 : f32 to vector<16x1xf32>
      %32 = arith.mulf %30, %31 : vector<16x1xf32>
      %cst_19 = arith.constant 9.99999974E-6 : f32
      %33 = vector.broadcast %cst_19 : f32 to vector<16x1xf32>
      %34 = arith.addf %32, %33 : vector<16x1xf32>
      %35 = math.rsqrt %34 : vector<16x1xf32>
      %36 = vector.broadcast %35 : vector<16x1xf32> to vector<16x128xf32>
      %37 = arith.mulf %27, %36 : vector<16x128xf32>
      %c0_20 = arith.constant 0 : index
      %c0_21 = arith.constant 0 : index
      %38 = vector.load %arg6[%c0_20, %c0_21] : memref<1x128xf32, #tpu.memory_space<vmem>>, vector<1x128xf32>
      %39 = vector.broadcast %38 : vector<1x128xf32> to vector<16x128xf32>
      %40 = arith.mulf %37, %39 : vector<16x128xf32>
      %c0_22 = arith.constant 0 : index
      %c0_23 = arith.constant 0 : index
      %41 = vector.load %arg7[%c0_22, %c0_23] : memref<1x128xf32, #tpu.memory_space<vmem>>, vector<1x128xf32>
      %42 = vector.broadcast %41 : vector<1x128xf32> to vector<16x128xf32>
      %43 = arith.addf %40, %42 : vector<16x128xf32>
      %44 = arith.truncf %43 : vector<16x128xf32> to vector<16x128xbf16>
      %c0_24 = arith.constant 0 : index
      %c0_25 = arith.constant 0 : index
      %45 = vector.load %arg10[%c0_24, %c0_25] : memref<16x128xbf16, #tpu.memory_space<vmem>>, vector<16x128xbf16>
      tpu.vector_store %arg10[%c0_24, %c0_25], %44 {strides = array<i32>} : memref<16x128xbf16, #tpu.memory_space<vmem>>, vector<16x128xbf16>,
    } else {
    }
    %c0 = arith.constant 0 : index
    %c0_3 = arith.constant 0 : index
    %6 = vector.load %arg10[%c0, %c0_3] : memref<16x128xbf16, #tpu.memory_space<vmem>>, vector<16x128xbf16>
    %c0_4 = arith.constant 0 : index
    %c0_5 = arith.constant 0 : index
    %7 = vector.load %arg9[%c0_4, %c0_5] : memref<16x128xf32, #tpu.memory_space<vmem>>, vector<16x128xf32>
    %c0_6 = arith.constant 0 : index
    %c0_7 = arith.constant 0 : index
    %8 = vector.load %arg4[%c0_6, %c0_7] : memref<128x128xf32, #tpu.memory_space<vmem>>, vector<128x128xf32>
    %9 = arith.truncf %8 : vector<128x128xf32> to vector<128x128xbf16>
    %cst = arith.constant dense<0.000000e+00> : vector<16x128xf32>
    %10 = tpu.matmul %6, %9, %cst {dimension_numbers = #tpu.dot_dimension_numbers<[1], [0], [0], [1], [0, 0, 1, 1], [], []>} : vector<16x128xbf16>, vector<128x128xbf16>, vector<16x128xf32> -> vector<16x128xf32>
    %11 = arith.addf %7, %10 : vector<16x128xf32>
    %c0_8 = arith.constant 0 : index
    %c0_9 = arith.constant 0 : index
    %12 = vector.load %arg9[%c0_8, %c0_9] : memref<16x128xf32, #tpu.memory_space<vmem>>, vector<16x128xf32>
    tpu.vector_store %arg9[%c0_8, %c0_9], %11 {strides = array<i32>} : memref<16x128xf32, #tpu.memory_space<vmem>>, vector<16x128xf32>,
    %c0_i32_10 = arith.constant 0 : i32
    %13 = arith.cmpi eq, %arg2, %c0_i32_10 : i32
    %14 = arith.extui %13 : i1 to i32
    %c0_i32_11 = arith.constant 0 : i32
    %15 = arith.cmpi ne, %14, %c0_i32_11 : i32
    scf.if %15 {
      %c0_12 = arith.constant 0 : index
      %c0_13 = arith.constant 0 : index
      %16 = vector.load %arg9[%c0_12, %c0_13] : memref<16x128xf32, #tpu.memory_space<vmem>>, vector<16x128xf32>
      %c0_14 = arith.constant 0 : index
      %c0_15 = arith.constant 0 : index
      %17 = vector.load %arg5[%c0_14, %c0_15] : memref<1x128xf32, #tpu.memory_space<vmem>>, vector<1x128xf32>
      %18 = vector.broadcast %17 : vector<1x128xf32> to vector<16x128xf32>
      %19 = arith.addf %16, %18 : vector<16x128xf32>
      %20 = arith.truncf %19 : vector<16x128xf32> to vector<16x128xbf16>
      %c0_16 = arith.constant 0 : index
      %c0_17 = arith.constant 0 : index
      %21 = vector.load %arg8[%c0_16, %c0_17] : memref<16x128xbf16, #tpu.memory_space<vmem>>, vector<16x128xbf16>
      tpu.vector_store %arg8[%c0_16, %c0_17], %20 {strides = array<i32>} : memref<16x128xbf16, #tpu.memory_space<vmem>>, vector<16x128xbf16>,
    } else {
    }
    return
  }
  func.func @transform_0(%arg0: i32, %arg1: i32, %arg2: i32) -> (i32, i32) {
    %c0_i32 = arith.constant 0 : i32
    return %arg0, %arg2 : i32, i32
  }
  func.func @transform_1(%arg0: i32, %arg1: i32, %arg2: i32) -> (i32, i32) {
    %c0_i32 = arith.constant 0 : i32
    return %arg2, %arg1 : i32, i32
  }
  func.func @transform_2(%arg0: i32, %arg1: i32, %arg2: i32) -> (i32, i32) {
    %c0_i32 = arith.constant 0 : i32
    %c0_i32_0 = arith.constant 0 : i32
    return %c0_i32, %arg1 : i32, i32
  }
  func.func @transform_3(%arg0: i32, %arg1: i32, %arg2: i32) -> (i32, i32) {
    %c0_i32 = arith.constant 0 : i32
    %c0_i32_0 = arith.constant 0 : i32
    return %c0_i32, %arg2 : i32, i32
  }
  func.func @transform_4(%arg0: i32, %arg1: i32, %arg2: i32) -> (i32, i32) {
    %c0_i32 = arith.constant 0 : i32
    %c0_i32_0 = arith.constant 0 : i32
    return %c0_i32, %arg2 : i32, i32
  }
  func.func @transform_5(%arg0: i32, %arg1: i32, %arg2: i32) -> (i32, i32) {
    %c0_i32 = arith.constant 0 : i32
    return %arg0, %arg1 : i32, i32
  }
}

module attributes {stable_mosaic.version = 11 : i64} {
  func.func @_linear_kernel(%arg0: i32, %arg1: i32, %arg2: i32, %arg3: memref<16x128xbf16, #tpu.memory_space<vmem>>, %arg4: memref<128x128xf32, #tpu.memory_space<vmem>>, %arg5: memref<1x128xf32, #tpu.memory_space<vmem>>, %arg6: memref<16x128xf32, #tpu.memory_space<vmem>>, %arg7: memref<16x128xf32, #tpu.memory_space<vmem>>, %arg8: memref<16x128xf32, #tpu.memory_space<vmem>>) attributes {dimension_semantics = [#tpu.dimension_semantics<parallel>, #tpu.dimension_semantics<parallel>, #tpu.dimension_semantics<arbitrary>], iteration_bounds = array<i64: 1, 1, 1>, scalar_prefetch = 0 : i64, scratch_operands = 1 : i64, tpu.core_type = #tpu.core_type<tc>, window_params = [{transform_indices = @transform_0, window_bounds = array<i64: 16, 128>}, {transform_indices = @transform_1, window_bounds = array<i64: 128, 128>}, {transform_indices = @transform_2, window_bounds = array<i64: 1, 128>}, {transform_indices = @transform_3, window_bounds = array<i64: 16, 128>}, {transform_indices = @transform_4, window_bounds = array<i64: 16, 128>}]} {
    %c0_i32 = arith.constant 0 : i32
    %0 = arith.cmpi eq, %arg2, %c0_i32 : i32
    %1 = arith.extui %0 : i1 to i32
    %c0_i32_0 = arith.constant 0 : i32
    %2 = arith.cmpi ne, %1, %c0_i32_0 : i32
    scf.if %2 {
      %cst_10 = arith.constant 0.000000e+00 : f32
      %13 = vector.broadcast %cst_10 : f32 to vector<16x128xf32>
      %c0_11 = arith.constant 0 : index
      %c0_12 = arith.constant 0 : index
      %14 = vector.load %arg8[%c0_11, %c0_12] : memref<16x128xf32, #tpu.memory_space<vmem>>, vector<16x128xf32>
      tpu.vector_store %arg8[%c0_11, %c0_12], %13 {strides = array<i32>} : memref<16x128xf32, #tpu.memory_space<vmem>>, vector<16x128xf32>,
    } else {
    }
    %c0 = arith.constant 0 : index
    %c0_1 = arith.constant 0 : index
    %3 = vector.load %arg3[%c0, %c0_1] : memref<16x128xbf16, #tpu.memory_space<vmem>>, vector<16x128xbf16>
    %c0_2 = arith.constant 0 : index
    %c0_3 = arith.constant 0 : index
    %4 = vector.load %arg8[%c0_2, %c0_3] : memref<16x128xf32, #tpu.memory_space<vmem>>, vector<16x128xf32>
    %c0_4 = arith.constant 0 : index
    %c0_5 = arith.constant 0 : index
    %5 = vector.load %arg4[%c0_4, %c0_5] : memref<128x128xf32, #tpu.memory_space<vmem>>, vector<128x128xf32>
    %6 = arith.truncf %5 : vector<128x128xf32> to vector<128x128xbf16>
    %cst = arith.constant dense<0.000000e+00> : vector<16x128xf32>
    %7 = tpu.matmul %3, %6, %cst {dimension_numbers = #tpu.dot_dimension_numbers<[1], [0], [0], [1], [0, 0, 1, 1], [], []>} : vector<16x128xbf16>, vector<128x128xbf16>, vector<16x128xf32> -> vector<16x128xf32>
    %8 = arith.addf %4, %7 : vector<16x128xf32>
    %c0_6 = arith.constant 0 : index
    %c0_7 = arith.constant 0 : index
    %9 = vector.load %arg8[%c0_6, %c0_7] : memref<16x128xf32, #tpu.memory_space<vmem>>, vector<16x128xf32>
    tpu.vector_store %arg8[%c0_6, %c0_7], %8 {strides = array<i32>} : memref<16x128xf32, #tpu.memory_space<vmem>>, vector<16x128xf32>,
    %c0_i32_8 = arith.constant 0 : i32
    %10 = arith.cmpi eq, %arg2, %c0_i32_8 : i32
    %11 = arith.extui %10 : i1 to i32
    %c0_i32_9 = arith.constant 0 : i32
    %12 = arith.cmpi ne, %11, %c0_i32_9 : i32
    scf.if %12 {
      %c0_10 = arith.constant 0 : index
      %c0_11 = arith.constant 0 : index
      %13 = vector.load %arg8[%c0_10, %c0_11] : memref<16x128xf32, #tpu.memory_space<vmem>>, vector<16x128xf32>
      %c0_12 = arith.constant 0 : index
      %c0_13 = arith.constant 0 : index
      %14 = vector.load %arg5[%c0_12, %c0_13] : memref<1x128xf32, #tpu.memory_space<vmem>>, vector<1x128xf32>
      %15 = vector.broadcast %14 : vector<1x128xf32> to vector<16x128xf32>
      %16 = arith.addf %13, %15 : vector<16x128xf32>
      %c0_14 = arith.constant 0 : index
      %c0_15 = arith.constant 0 : index
      %17 = vector.load %arg6[%c0_14, %c0_15] : memref<16x128xf32, #tpu.memory_space<vmem>>, vector<16x128xf32>
      %18 = arith.addf %16, %17 : vector<16x128xf32>
      %c0_16 = arith.constant 0 : index
      %c0_17 = arith.constant 0 : index
      %19 = vector.load %arg7[%c0_16, %c0_17] : memref<16x128xf32, #tpu.memory_space<vmem>>, vector<16x128xf32>
      tpu.vector_store %arg7[%c0_16, %c0_17], %18 {strides = array<i32>} : memref<16x128xf32, #tpu.memory_space<vmem>>, vector<16x128xf32>,
    } else {
    }
    return
  }
  func.func @transform_0(%arg0: i32, %arg1: i32, %arg2: i32) -> (i32, i32) {
    %c0_i32 = arith.constant 0 : i32
    return %arg0, %arg2 : i32, i32
  }
  func.func @transform_1(%arg0: i32, %arg1: i32, %arg2: i32) -> (i32, i32) {
    %c0_i32 = arith.constant 0 : i32
    return %arg2, %arg1 : i32, i32
  }
  func.func @transform_2(%arg0: i32, %arg1: i32, %arg2: i32) -> (i32, i32) {
    %c0_i32 = arith.constant 0 : i32
    %c0_i32_0 = arith.constant 0 : i32
    return %c0_i32, %arg1 : i32, i32
  }
  func.func @transform_3(%arg0: i32, %arg1: i32, %arg2: i32) -> (i32, i32) {
    %c0_i32 = arith.constant 0 : i32
    return %arg0, %arg1 : i32, i32
  }
  func.func @transform_4(%arg0: i32, %arg1: i32, %arg2: i32) -> (i32, i32) {
    %c0_i32 = arith.constant 0 : i32
    return %arg0, %arg1 : i32, i32
  }
}

module attributes {stable_mosaic.version = 11 : i64} {
  func.func @_attn_kernel(%arg0: i32, %arg1: i32, %arg2: memref<1x8x32xbf16, #tpu.memory_space<vmem>>, %arg3: memref<1x8x32xbf16, #tpu.memory_space<vmem>>, %arg4: memref<1x8x32xbf16, #tpu.memory_space<vmem>>, %arg5: memref<1x8x32xbf16, #tpu.memory_space<vmem>>) attributes {dimension_semantics = [#tpu.dimension_semantics<parallel>, #tpu.dimension_semantics<parallel>], iteration_bounds = array<i64: 2, 1>, scalar_prefetch = 0 : i64, scratch_operands = 0 : i64, tpu.core_type = #tpu.core_type<tc>, window_params = [{transform_indices = @transform_0, window_bounds = array<i64: 1, 8, 32>}, {transform_indices = @transform_1, window_bounds = array<i64: 1, 8, 32>}, {transform_indices = @transform_2, window_bounds = array<i64: 1, 8, 32>}, {transform_indices = @transform_3, window_bounds = array<i64: 1, 8, 32>}]} {
    %c0 = arith.constant 0 : index
    %c0_0 = arith.constant 0 : index
    %c0_1 = arith.constant 0 : index
    %0 = vector.load %arg2[%c0, %c0_0, %c0_1] : memref<1x8x32xbf16, #tpu.memory_space<vmem>>, vector<1x8x32xbf16>
    %1 = vector.shape_cast %0 : vector<1x8x32xbf16> to vector<8x32xbf16>
    %c0_2 = arith.constant 0 : index
    %c0_3 = arith.constant 0 : index
    %c0_4 = arith.constant 0 : index
    %2 = vector.load %arg3[%c0_2, %c0_3, %c0_4] : memref<1x8x32xbf16, #tpu.memory_space<vmem>>, vector<1x8x32xbf16>
    %3 = vector.shape_cast %2 : vector<1x8x32xbf16> to vector<8x32xbf16>
    %c0_5 = arith.constant 0 : index
    %c0_6 = arith.constant 0 : index
    %c0_7 = arith.constant 0 : index
    %4 = vector.load %arg4[%c0_5, %c0_6, %c0_7] : memref<1x8x32xbf16, #tpu.memory_space<vmem>>, vector<1x8x32xbf16>
    %5 = vector.shape_cast %4 : vector<1x8x32xbf16> to vector<8x32xbf16>
    %6 = vector.extract_strided_slice %1 {offsets = [0, 0], sizes = [8, 8], strides = [1, 1]} : vector<8x32xbf16> to vector<8x8xbf16>
    %7 = vector.extract_strided_slice %3 {offsets = [0, 0], sizes = [8, 8], strides = [1, 1]} : vector<8x32xbf16> to vector<8x8xbf16>
    %8 = vector.extract_strided_slice %5 {offsets = [0, 0], sizes = [8, 8], strides = [1, 1]} : vector<8x32xbf16> to vector<8x8xbf16>
    %cst = arith.constant dense<0.000000e+00> : vector<8x8xf32>
    %9 = tpu.matmul %6, %7, %cst {dimension_numbers = #tpu.dot_dimension_numbers<[1], [1], [0], [0], [0, 0, 1, 0], [], []>} : vector<8x8xbf16>, vector<8x8xbf16>, vector<8x8xf32> -> vector<8x8xf32>
    %cst_8 = arith.constant dense<0xFF800000> : vector<8xf32>
    %10 = vector.multi_reduction <maximumf>, %9, %cst_8 [1] : vector<8x8xf32> to vector<8xf32>
    %11 = vector.shape_cast %10 : vector<8xf32> to vector<8x1xf32>
    %12 = vector.broadcast %11 : vector<8x1xf32> to vector<8x8xf32>
    %13 = arith.subf %9, %12 : vector<8x8xf32>
    %14 = math.exp %13 : vector<8x8xf32>
    %cst_9 = arith.constant dense<0.000000e+00> : vector<8xf32>
    %15 = vector.multi_reduction <add>, %14, %cst_9 [1] : vector<8x8xf32> to vector<8xf32>
    %16 = vector.shape_cast %15 : vector<8xf32> to vector<8x1xf32>
    %17 = arith.truncf %14 : vector<8x8xf32> to vector<8x8xbf16>
    %cst_10 = arith.constant dense<0.000000e+00> : vector<8x8xf32>
    %18 = tpu.matmul %17, %8, %cst_10 {dimension_numbers = #tpu.dot_dimension_numbers<[1], [0], [0], [1], [0, 0, 1, 1], [], []>} : vector<8x8xbf16>, vector<8x8xbf16>, vector<8x8xf32> -> vector<8x8xf32>
    %19 = vector.broadcast %16 : vector<8x1xf32> to vector<8x8xf32>
    %20 = arith.divf %18, %19 : vector<8x8xf32>
    %21 = vector.extract_strided_slice %1 {offsets = [0, 8], sizes = [8, 8], strides = [1, 1]} : vector<8x32xbf16> to vector<8x8xbf16>
    %22 = vector.extract_strided_slice %3 {offsets = [0, 8], sizes = [8, 8], strides = [1, 1]} : vector<8x32xbf16> to vector<8x8xbf16>
    %23 = vector.extract_strided_slice %5 {offsets = [0, 8], sizes = [8, 8], strides = [1, 1]} : vector<8x32xbf16> to vector<8x8xbf16>
    %cst_11 = arith.constant dense<0.000000e+00> : vector<8x8xf32>
    %24 = tpu.matmul %21, %22, %cst_11 {dimension_numbers = #tpu.dot_dimension_numbers<[1], [1], [0], [0], [0, 0, 1, 0], [], []>} : vector<8x8xbf16>, vector<8x8xbf16>, vector<8x8xf32> -> vector<8x8xf32>
    %cst_12 = arith.constant dense<0xFF800000> : vector<8xf32>
    %25 = vector.multi_reduction <maximumf>, %24, %cst_12 [1] : vector<8x8xf32> to vector<8xf32>
    %26 = vector.shape_cast %25 : vector<8xf32> to vector<8x1xf32>
    %27 = vector.broadcast %26 : vector<8x1xf32> to vector<8x8xf32>
    %28 = arith.subf %24, %27 : vector<8x8xf32>
    %29 = math.exp %28 : vector<8x8xf32>
    %cst_13 = arith.constant dense<0.000000e+00> : vector<8xf32>
    %30 = vector.multi_reduction <add>, %29, %cst_13 [1] : vector<8x8xf32> to vector<8xf32>
    %31 = vector.shape_cast %30 : vector<8xf32> to vector<8x1xf32>
    %32 = arith.truncf %29 : vector<8x8xf32> to vector<8x8xbf16>
    %cst_14 = arith.constant dense<0.000000e+00> : vector<8x8xf32>
    %33 = tpu.matmul %32, %23, %cst_14 {dimension_numbers = #tpu.dot_dimension_numbers<[1], [0], [0], [1], [0, 0, 1, 1], [], []>} : vector<8x8xbf16>, vector<8x8xbf16>, vector<8x8xf32> -> vector<8x8xf32>
    %34 = vector.broadcast %31 : vector<8x1xf32> to vector<8x8xf32>
    %35 = arith.divf %33, %34 : vector<8x8xf32>
    %36 = vector.extract_strided_slice %1 {offsets = [0, 16], sizes = [8, 8], strides = [1, 1]} : vector<8x32xbf16> to vector<8x8xbf16>
    %37 = vector.extract_strided_slice %3 {offsets = [0, 16], sizes = [8, 8], strides = [1, 1]} : vector<8x32xbf16> to vector<8x8xbf16>
    %38 = vector.extract_strided_slice %5 {offsets = [0, 16], sizes = [8, 8], strides = [1, 1]} : vector<8x32xbf16> to vector<8x8xbf16>
    %cst_15 = arith.constant dense<0.000000e+00> : vector<8x8xf32>
    %39 = tpu.matmul %36, %37, %cst_15 {dimension_numbers = #tpu.dot_dimension_numbers<[1], [1], [0], [0], [0, 0, 1, 0], [], []>} : vector<8x8xbf16>, vector<8x8xbf16>, vector<8x8xf32> -> vector<8x8xf32>
    %cst_16 = arith.constant dense<0xFF800000> : vector<8xf32>
    %40 = vector.multi_reduction <maximumf>, %39, %cst_16 [1] : vector<8x8xf32> to vector<8xf32>
    %41 = vector.shape_cast %40 : vector<8xf32> to vector<8x1xf32>
    %42 = vector.broadcast %41 : vector<8x1xf32> to vector<8x8xf32>
    %43 = arith.subf %39, %42 : vector<8x8xf32>
    %44 = math.exp %43 : vector<8x8xf32>
    %cst_17 = arith.constant dense<0.000000e+00> : vector<8xf32>
    %45 = vector.multi_reduction <add>, %44, %cst_17 [1] : vector<8x8xf32> to vector<8xf32>
    %46 = vector.shape_cast %45 : vector<8xf32> to vector<8x1xf32>
    %47 = arith.truncf %44 : vector<8x8xf32> to vector<8x8xbf16>
    %cst_18 = arith.constant dense<0.000000e+00> : vector<8x8xf32>
    %48 = tpu.matmul %47, %38, %cst_18 {dimension_numbers = #tpu.dot_dimension_numbers<[1], [0], [0], [1], [0, 0, 1, 1], [], []>} : vector<8x8xbf16>, vector<8x8xbf16>, vector<8x8xf32> -> vector<8x8xf32>
    %49 = vector.broadcast %46 : vector<8x1xf32> to vector<8x8xf32>
    %50 = arith.divf %48, %49 : vector<8x8xf32>
    %51 = vector.extract_strided_slice %1 {offsets = [0, 24], sizes = [8, 8], strides = [1, 1]} : vector<8x32xbf16> to vector<8x8xbf16>
    %52 = vector.extract_strided_slice %3 {offsets = [0, 24], sizes = [8, 8], strides = [1, 1]} : vector<8x32xbf16> to vector<8x8xbf16>
    %53 = vector.extract_strided_slice %5 {offsets = [0, 24], sizes = [8, 8], strides = [1, 1]} : vector<8x32xbf16> to vector<8x8xbf16>
    %cst_19 = arith.constant dense<0.000000e+00> : vector<8x8xf32>
    %54 = tpu.matmul %51, %52, %cst_19 {dimension_numbers = #tpu.dot_dimension_numbers<[1], [1], [0], [0], [0, 0, 1, 0], [], []>} : vector<8x8xbf16>, vector<8x8xbf16>, vector<8x8xf32> -> vector<8x8xf32>
    %cst_20 = arith.constant dense<0xFF800000> : vector<8xf32>
    %55 = vector.multi_reduction <maximumf>, %54, %cst_20 [1] : vector<8x8xf32> to vector<8xf32>
    %56 = vector.shape_cast %55 : vector<8xf32> to vector<8x1xf32>
    %57 = vector.broadcast %56 : vector<8x1xf32> to vector<8x8xf32>
    %58 = arith.subf %54, %57 : vector<8x8xf32>
    %59 = math.exp %58 : vector<8x8xf32>
    %cst_21 = arith.constant dense<0.000000e+00> : vector<8xf32>
    %60 = vector.multi_reduction <add>, %59, %cst_21 [1] : vector<8x8xf32> to vector<8xf32>
    %61 = vector.shape_cast %60 : vector<8xf32> to vector<8x1xf32>
    %62 = arith.truncf %59 : vector<8x8xf32> to vector<8x8xbf16>
    %cst_22 = arith.constant dense<0.000000e+00> : vector<8x8xf32>
    %63 = tpu.matmul %62, %53, %cst_22 {dimension_numbers = #tpu.dot_dimension_numbers<[1], [0], [0], [1], [0, 0, 1, 1], [], []>} : vector<8x8xbf16>, vector<8x8xbf16>, vector<8x8xf32> -> vector<8x8xf32>
    %64 = vector.broadcast %61 : vector<8x1xf32> to vector<8x8xf32>
    %65 = arith.divf %63, %64 : vector<8x8xf32>
    %66 = tpu.concatenate %20, %35, %50, %65 in 1 : vector<8x8xf32>, vector<8x8xf32>, vector<8x8xf32>, vector<8x8xf32> -> vector<8x32xf32>
    %67 = arith.truncf %66 : vector<8x32xf32> to vector<8x32xbf16>
    %c0_23 = arith.constant 0 : index
    %c0_24 = arith.constant 0 : index
    %c0_25 = arith.constant 0 : index
    %68 = vector.load %arg5[%c0_23, %c0_24, %c0_25] : memref<1x8x32xbf16, #tpu.memory_space<vmem>>, vector<1x8x32xbf16>
    %69 = vector.shape_cast %68 : vector<1x8x32xbf16> to vector<8x32xbf16>
    %70 = vector.shape_cast %67 : vector<8x32xbf16> to vector<1x8x32xbf16>
    tpu.vector_store %arg5[%c0_23, %c0_24, %c0_25], %70 {strides = array<i32>} : memref<1x8x32xbf16, #tpu.memory_space<vmem>>, vector<1x8x32xbf16>,
    return
  }
  func.func @transform_0(%arg0: i32, %arg1: i32) -> (i32, i32, i32) {
    %c0_i32 = arith.constant 0 : i32
    %c0_i32_0 = arith.constant 0 : i32
    return %arg0, %arg1, %c0_i32 : i32, i32, i32
  }
  func.func @transform_1(%arg0: i32, %arg1: i32) -> (i32, i32, i32) {
    %c0_i32 = arith.constant 0 : i32
    %c0_i32_0 = arith.constant 0 : i32
    %c0_i32_1 = arith.constant 0 : i32
    return %arg0, %c0_i32, %c0_i32_0 : i32, i32, i32
  }
  func.func @transform_2(%arg0: i32, %arg1: i32) -> (i32, i32, i32) {
    %c0_i32 = arith.constant 0 : i32
    %c0_i32_0 = arith.constant 0 : i32
    %c0_i32_1 = arith.constant 0 : i32
    return %arg0, %c0_i32, %c0_i32_0 : i32, i32, i32
  }
  func.func @transform_3(%arg0: i32, %arg1: i32) -> (i32, i32, i32) {
    %c0_i32 = arith.constant 0 : i32
    %c0_i32_0 = arith.constant 0 : i32
    return %arg0, %arg1, %c0_i32 : i32, i32, i32
  }
}

module attributes {stable_mosaic.version = 11 : i64} {
  func.func @_linear_kernel(%arg0: i32, %arg1: i32, %arg2: i32, %arg3: memref<16x128xf32, #tpu.memory_space<vmem>>, %arg4: memref<128x128xf32, #tpu.memory_space<vmem>>, %arg5: memref<1x128xf32, #tpu.memory_space<vmem>>, %arg6: memref<1x128xf32, #tpu.memory_space<vmem>>, %arg7: memref<1x128xf32, #tpu.memory_space<vmem>>, %arg8: memref<16x128xbf16, #tpu.memory_space<vmem>>, %arg9: memref<16x128xf32, #tpu.memory_space<vmem>>, %arg10: memref<16x128xbf16, #tpu.memory_space<vmem>>) attributes {dimension_semantics = [#tpu.dimension_semantics<parallel>, #tpu.dimension_semantics<arbitrary>, #tpu.dimension_semantics<arbitrary>], iteration_bounds = array<i64: 1, 1, 1>, scalar_prefetch = 0 : i64, scratch_operands = 2 : i64, tpu.core_type = #tpu.core_type<tc>, window_params = [{transform_indices = @transform_0, window_bounds = array<i64: 16, 128>}, {transform_indices = @transform_1, window_bounds = array<i64: 128, 128>}, {transform_indices = @transform_2, window_bounds = array<i64: 1, 128>}, {transform_indices = @transform_3, window_bounds = array<i64: 1, 128>}, {transform_indices = @transform_4, window_bounds = array<i64: 1, 128>}, {transform_indices = @transform_5, window_bounds = array<i64: 16, 128>}]} {
    %c0_i32 = arith.constant 0 : i32
    %0 = arith.cmpi eq, %arg2, %c0_i32 : i32
    %1 = arith.extui %0 : i1 to i32
    %c0_i32_0 = arith.constant 0 : i32
    %2 = arith.cmpi ne, %1, %c0_i32_0 : i32
    scf.if %2 {
      %cst_12 = arith.constant 0.000000e+00 : f32
      %16 = vector.broadcast %cst_12 : f32 to vector<16x128xf32>
      %c0_13 = arith.constant 0 : index
      %c0_14 = arith.constant 0 : index
      %17 = vector.load %arg9[%c0_13, %c0_14] : memref<16x128xf32, #tpu.memory_space<vmem>>, vector<16x128xf32>
      tpu.vector_store %arg9[%c0_13, %c0_14], %16 {strides = array<i32>} : memref<16x128xf32, #tpu.memory_space<vmem>>, vector<16x128xf32>,
    } else {
    }
    %c0_i32_1 = arith.constant 0 : i32
    %3 = arith.cmpi eq, %arg1, %c0_i32_1 : i32
    %4 = arith.extui %3 : i1 to i32
    %c0_i32_2 = arith.constant 0 : i32
    %5 = arith.cmpi ne, %4, %c0_i32_2 : i32
    scf.if %5 {
      %c0_12 = arith.constant 0 : index
      %c0_13 = arith.constant 0 : index
      %16 = vector.load %arg3[%c0_12, %c0_13] : memref<16x128xf32, #tpu.memory_space<vmem>>, vector<16x128xf32>
      %cst_14 = arith.constant dense<0.000000e+00> : vector<16xf32>
      %17 = vector.multi_reduction <add>, %16, %cst_14 [1] : vector<16x128xf32> to vector<16xf32>
      %18 = vector.shape_cast %17 : vector<16xf32> to vector<16x1xf32>
      %cst_15 = arith.constant 3.125000e-02 : f32
      %19 = vector.broadcast %cst_15 : f32 to vector<16x1xf32>
      %20 = arith.mulf %18, %19 : vector<16x1xf32>
      %21 = vector.broadcast %20 : vector<16x1xf32> to vector<16x128xf32>
      %22 = arith.subf %16, %21 : vector<16x128xf32>
      %23 = tpu.iota {dimensions = array<i32: 1>} : vector<16x128xi32>
      %c32_i32 = arith.constant 32 : i32
      %24 = vector.broadcast %c32_i32 : i32 to vector<16x128xi32>
      %25 = arith.cmpi slt, %23, %24 : vector<16x128xi32>
      %cst_16 = arith.constant 0.000000e+00 : f32
      %26 = vector.broadcast %cst_16 : f32 to vector<16x128xf32>
      %27 = arith.select %25, %22, %26 : vector<16x128xi1>, vector<16x128xf32>
      %28 = arith.mulf %27, %27 : vector<16x128xf32>
      %cst_17 = arith.constant dense<0.000000e+00> : vector<16xf32>
      %29 = vector.multi_reduction <add>, %28, %cst_17 [1] : vector<16x128xf32> to vector<16xf32>
      %30 = vector.shape_cast %29 : vector<16xf32> to vector<16x1xf32>
      %cst_18 = arith.constant 3.125000e-02 : f32
      %31 = vector.broadcast %cst_18 : f32 to vector<16x1xf32>
      %32 = arith.mulf %30, %31 : vector<16x1xf32>
      %cst_19 = arith.constant 9.99999974E-6 : f32
      %33 = vector.broadcast %cst_19 : f32 to vector<16x1xf32>
      %34 = arith.addf %32, %33 : vector<16x1xf32>
      %35 = math.rsqrt %34 : vector<16x1xf32>
      %36 = vector.broadcast %35 : vector<16x1xf32> to vector<16x128xf32>
      %37 = arith.mulf %27, %36 : vector<16x128xf32>
      %c0_20 = arith.constant 0 : index
      %c0_21 = arith.constant 0 : index
      %38 = vector.load %arg6[%c0_20, %c0_21] : memref<1x128xf32, #tpu.memory_space<vmem>>, vector<1x128xf32>
      %39 = vector.broadcast %38 : vector<1x128xf32> to vector<16x128xf32>
      %40 = arith.mulf %37, %39 : vector<16x128xf32>
      %c0_22 = arith.constant 0 : index
      %c0_23 = arith.constant 0 : index
      %41 = vector.load %arg7[%c0_22, %c0_23] : memref<1x128xf32, #tpu.memory_space<vmem>>, vector<1x128xf32>
      %42 = vector.broadcast %41 : vector<1x128xf32> to vector<16x128xf32>
      %43 = arith.addf %40, %42 : vector<16x128xf32>
      %44 = arith.truncf %43 : vector<16x128xf32> to vector<16x128xbf16>
      %c0_24 = arith.constant 0 : index
      %c0_25 = arith.constant 0 : index
      %45 = vector.load %arg10[%c0_24, %c0_25] : memref<16x128xbf16, #tpu.memory_space<vmem>>, vector<16x128xbf16>
      tpu.vector_store %arg10[%c0_24, %c0_25], %44 {strides = array<i32>} : memref<16x128xbf16, #tpu.memory_space<vmem>>, vector<16x128xbf16>,
    } else {
    }
    %c0 = arith.constant 0 : index
    %c0_3 = arith.constant 0 : index
    %6 = vector.load %arg10[%c0, %c0_3] : memref<16x128xbf16, #tpu.memory_space<vmem>>, vector<16x128xbf16>
    %c0_4 = arith.constant 0 : index
    %c0_5 = arith.constant 0 : index
    %7 = vector.load %arg9[%c0_4, %c0_5] : memref<16x128xf32, #tpu.memory_space<vmem>>, vector<16x128xf32>
    %c0_6 = arith.constant 0 : index
    %c0_7 = arith.constant 0 : index
    %8 = vector.load %arg4[%c0_6, %c0_7] : memref<128x128xf32, #tpu.memory_space<vmem>>, vector<128x128xf32>
    %9 = arith.truncf %8 : vector<128x128xf32> to vector<128x128xbf16>
    %cst = arith.constant dense<0.000000e+00> : vector<16x128xf32>
    %10 = tpu.matmul %6, %9, %cst {dimension_numbers = #tpu.dot_dimension_numbers<[1], [0], [0], [1], [0, 0, 1, 1], [], []>} : vector<16x128xbf16>, vector<128x128xbf16>, vector<16x128xf32> -> vector<16x128xf32>
    %11 = arith.addf %7, %10 : vector<16x128xf32>
    %c0_8 = arith.constant 0 : index
    %c0_9 = arith.constant 0 : index
    %12 = vector.load %arg9[%c0_8, %c0_9] : memref<16x128xf32, #tpu.memory_space<vmem>>, vector<16x128xf32>
    tpu.vector_store %arg9[%c0_8, %c0_9], %11 {strides = array<i32>} : memref<16x128xf32, #tpu.memory_space<vmem>>, vector<16x128xf32>,
    %c0_i32_10 = arith.constant 0 : i32
    %13 = arith.cmpi eq, %arg2, %c0_i32_10 : i32
    %14 = arith.extui %13 : i1 to i32
    %c0_i32_11 = arith.constant 0 : i32
    %15 = arith.cmpi ne, %14, %c0_i32_11 : i32
    scf.if %15 {
      %c0_12 = arith.constant 0 : index
      %c0_13 = arith.constant 0 : index
      %16 = vector.load %arg9[%c0_12, %c0_13] : memref<16x128xf32, #tpu.memory_space<vmem>>, vector<16x128xf32>
      %c0_14 = arith.constant 0 : index
      %c0_15 = arith.constant 0 : index
      %17 = vector.load %arg5[%c0_14, %c0_15] : memref<1x128xf32, #tpu.memory_space<vmem>>, vector<1x128xf32>
      %18 = vector.broadcast %17 : vector<1x128xf32> to vector<16x128xf32>
      %19 = arith.addf %16, %18 : vector<16x128xf32>
      %cst_16 = arith.constant 5.000000e-01 : f32
      %20 = vector.broadcast %cst_16 : f32 to vector<16x128xf32>
      %21 = arith.mulf %20, %19 : vector<16x128xf32>
      %cst_17 = arith.constant 0.707106769 : f32
      %22 = vector.broadcast %cst_17 : f32 to vector<16x128xf32>
      %23 = arith.mulf %19, %22 : vector<16x128xf32>
      %cst_18 = arith.constant 0.000000e+00 : f32
      %24 = vector.broadcast %cst_18 : f32 to vector<16x128xf32>
      %25 = arith.cmpf olt, %23, %24 : vector<16x128xf32>
      %cst_19 = arith.constant -1.000000e+00 : f32
      %cst_20 = arith.constant 1.000000e+00 : f32
      %26 = vector.broadcast %cst_19 : f32 to vector<16x128xf32>
      %27 = vector.broadcast %cst_20 : f32 to vector<16x128xf32>
      %28 = arith.select %25, %26, %27 : vector<16x128xi1>, vector<16x128xf32>
      %29 = math.absf %23 : vector<16x128xf32>
      %cst_21 = arith.constant 0.327591091 : f32
      %30 = vector.broadcast %cst_21 : f32 to vector<16x128xf32>
      %31 = arith.mulf %30, %29 : vector<16x128xf32>
      %cst_22 = arith.constant 1.000000e+00 : f32
      %32 = vector.broadcast %cst_22 : f32 to vector<16x128xf32>
      %33 = arith.addf %32, %31 : vector<16x128xf32>
      %cst_23 = arith.constant 1.000000e+00 : f32
      %34 = vector.broadcast %cst_23 : f32 to vector<16x128xf32>
      %35 = arith.divf %34, %33 : vector<16x128xf32>
      %cst_24 = arith.constant 1.06140542 : f32
      %36 = vector.broadcast %cst_24 : f32 to vector<16x128xf32>
      %37 = arith.mulf %36, %35 : vector<16x128xf32>
      %cst_25 = arith.constant -1.45315206 : f32
      %38 = vector.broadcast %cst_25 : f32 to vector<16x128xf32>
      %39 = arith.addf %37, %38 : vector<16x128xf32>
      %40 = arith.mulf %39, %35 : vector<16x128xf32>
      %cst_26 = arith.constant 1.42141378 : f32
      %41 = vector.broadcast %cst_26 : f32 to vector<16x128xf32>
      %42 = arith.addf %40, %41 : vector<16x128xf32>
      %43 = arith.mulf %42, %35 : vector<16x128xf32>
      %cst_27 = arith.constant -0.284496725 : f32
      %44 = vector.broadcast %cst_27 : f32 to vector<16x128xf32>
      %45 = arith.addf %43, %44 : vector<16x128xf32>
      %46 = arith.mulf %45, %35 : vector<16x128xf32>
      %cst_28 = arith.constant 0.254829586 : f32
      %47 = vector.broadcast %cst_28 : f32 to vector<16x128xf32>
      %48 = arith.addf %46, %47 : vector<16x128xf32>
      %49 = arith.mulf %48, %35 : vector<16x128xf32>
      %cst_29 = arith.constant 0.000000e+00 : f32
      %50 = vector.broadcast %cst_29 : f32 to vector<16x128xf32>
      %51 = arith.subf %50, %29 : vector<16x128xf32>
      %52 = arith.mulf %51, %29 : vector<16x128xf32>
      %53 = math.exp %52 : vector<16x128xf32>
      %54 = arith.mulf %49, %53 : vector<16x128xf32>
      %cst_30 = arith.constant 1.000000e+00 : f32
      %55 = vector.broadcast %cst_30 : f32 to vector<16x128xf32>
      %56 = arith.subf %55, %54 : vector<16x128xf32>
      %57 = arith.mulf %28, %56 : vector<16x128xf32>
      %cst_31 = arith.constant 1.000000e+00 : f32
      %58 = vector.broadcast %cst_31 : f32 to vector<16x128xf32>
      %59 = arith.addf %58, %57 : vector<16x128xf32>
      %60 = arith.mulf %21, %59 : vector<16x128xf32>
      %61 = arith.truncf %60 : vector<16x128xf32> to vector<16x128xbf16>
      %c0_32 = arith.constant 0 : index
      %c0_33 = arith.constant 0 : index
      %62 = vector.load %arg8[%c0_32, %c0_33] : memref<16x128xbf16, #tpu.memory_space<vmem>>, vector<16x128xbf16>
      tpu.vector_store %arg8[%c0_32, %c0_33], %61 {strides = array<i32>} : memref<16x128xbf16, #tpu.memory_space<vmem>>, vector<16x128xbf16>,
    } else {
    }
    return
  }
  func.func @transform_0(%arg0: i32, %arg1: i32, %arg2: i32) -> (i32, i32) {
    %c0_i32 = arith.constant 0 : i32
    return %arg0, %arg2 : i32, i32
  }
  func.func @transform_1(%arg0: i32, %arg1: i32, %arg2: i32) -> (i32, i32) {
    %c0_i32 = arith.constant 0 : i32
    return %arg2, %arg1 : i32, i32
  }
  func.func @transform_2(%arg0: i32, %arg1: i32, %arg2: i32) -> (i32, i32) {
    %c0_i32 = arith.constant 0 : i32
    %c0_i32_0 = arith.constant 0 : i32
    return %c0_i32, %arg1 : i32, i32
  }
  func.func @transform_3(%arg0: i32, %arg1: i32, %arg2: i32) -> (i32, i32) {
    %c0_i32 = arith.constant 0 : i32
    %c0_i32_0 = arith.constant 0 : i32
    return %c0_i32, %arg2 : i32, i32
  }
  func.func @transform_4(%arg0: i32, %arg1: i32, %arg2: i32) -> (i32, i32) {
    %c0_i32 = arith.constant 0 : i32
    %c0_i32_0 = arith.constant 0 : i32
    return %c0_i32, %arg2 : i32, i32
  }
  func.func @transform_5(%arg0: i32, %arg1: i32, %arg2: i32) -> (i32, i32) {
    %c0_i32 = arith.constant 0 : i32
    return %arg0, %arg1 : i32, i32
  }
}

module attributes {stable_mosaic.version = 11 : i64} {
  func.func @_pool_cls_kernel(%arg0: i32, %arg1: memref<2x8x32xf32, #tpu.memory_space<vmem>>, %arg2: memref<1x1x32xf32, #tpu.memory_space<vmem>>, %arg3: memref<1x1x32xf32, #tpu.memory_space<vmem>>, %arg4: memref<32x11xf32, #tpu.memory_space<vmem>>, %arg5: memref<1x11xf32, #tpu.memory_space<vmem>>, %arg6: memref<2x11xf32, #tpu.memory_space<vmem>>, %arg7: memref<2x32xf32, #tpu.memory_space<vmem>>) attributes {dimension_semantics = [#tpu.dimension_semantics<arbitrary>], iteration_bounds = array<i64: 1>, scalar_prefetch = 0 : i64, scratch_operands = 1 : i64, tpu.core_type = #tpu.core_type<tc>, window_params = [{transform_indices = @transform_0, window_bounds = array<i64: 2, 8, 32>}, {pipeline_mode = #tpu.pipeline_mode<synchronous>, transform_indices = @transform_1, window_bounds = array<i64: 1, 1, 32>}, {pipeline_mode = #tpu.pipeline_mode<synchronous>, transform_indices = @transform_2, window_bounds = array<i64: 1, 1, 32>}, {pipeline_mode = #tpu.pipeline_mode<synchronous>, transform_indices = @transform_3, window_bounds = array<i64: 32, 11>}, {pipeline_mode = #tpu.pipeline_mode<synchronous>, transform_indices = @transform_4, window_bounds = array<i64: 1, 11>}, {pipeline_mode = #tpu.pipeline_mode<synchronous>, transform_indices = @transform_5, window_bounds = array<i64: 2, 11>}]} {
    %c0_i32 = arith.constant 0 : i32
    %0 = arith.cmpi eq, %arg0, %c0_i32 : i32
    %1 = arith.extui %0 : i1 to i32
    %c0_i32_0 = arith.constant 0 : i32
    %2 = arith.cmpi ne, %1, %c0_i32_0 : i32
    scf.if %2 {
      %cst_20 = arith.constant 0.000000e+00 : f32
      %33 = vector.broadcast %cst_20 : f32 to vector<2x32xf32>
      %c0_21 = arith.constant 0 : index
      %c0_22 = arith.constant 0 : index
      %34 = vector.load %arg7[%c0_21, %c0_22] : memref<2x32xf32, #tpu.memory_space<vmem>>, vector<2x32xf32>
      tpu.vector_store %arg7[%c0_21, %c0_22], %33 {strides = array<i32>} : memref<2x32xf32, #tpu.memory_space<vmem>>, vector<2x32xf32>,
    } else {
    }
    %c0 = arith.constant 0 : index
    %c0_1 = arith.constant 0 : index
    %c0_2 = arith.constant 0 : index
    %3 = vector.load %arg1[%c0, %c0_1, %c0_2] : memref<2x8x32xf32, #tpu.memory_space<vmem>>, vector<2x8x32xf32>
    %cst = arith.constant dense<0.000000e+00> : vector<2x8xf32>
    %4 = vector.multi_reduction <add>, %3, %cst [2] : vector<2x8x32xf32> to vector<2x8xf32>
    %5 = vector.shape_cast %4 : vector<2x8xf32> to vector<2x8x1xf32>
    %cst_3 = arith.constant 3.125000e-02 : f32
    %6 = vector.broadcast %cst_3 : f32 to vector<2x8x1xf32>
    %7 = arith.mulf %5, %6 : vector<2x8x1xf32>
    %8 = vector.broadcast %7 : vector<2x8x1xf32> to vector<2x8x32xf32>
    %9 = arith.subf %3, %8 : vector<2x8x32xf32>
    %10 = arith.mulf %9, %9 : vector<2x8x32xf32>
    %cst_4 = arith.constant dense<0.000000e+00> : vector<2x8xf32>
    %11 = vector.multi_reduction <add>, %10, %cst_4 [2] : vector<2x8x32xf32> to vector<2x8xf32>
    %12 = vector.shape_cast %11 : vector<2x8xf32> to vector<2x8x1xf32>
    %cst_5 = arith.constant 3.125000e-02 : f32
    %13 = vector.broadcast %cst_5 : f32 to vector<2x8x1xf32>
    %14 = arith.mulf %12, %13 : vector<2x8x1xf32>
    %cst_6 = arith.constant 9.99999974E-6 : f32
    %15 = vector.broadcast %cst_6 : f32 to vector<2x8x1xf32>
    %16 = arith.addf %14, %15 : vector<2x8x1xf32>
    %17 = math.rsqrt %16 : vector<2x8x1xf32>
    %18 = vector.broadcast %17 : vector<2x8x1xf32> to vector<2x8x32xf32>
    %19 = arith.mulf %9, %18 : vector<2x8x32xf32>
    %c0_7 = arith.constant 0 : index
    %c0_8 = arith.constant 0 : index
    %c0_9 = arith.constant 0 : index
    %20 = vector.load %arg2[%c0_7, %c0_8, %c0_9] : memref<1x1x32xf32, #tpu.memory_space<vmem>>, vector<1x1x32xf32>
    %21 = vector.broadcast %20 : vector<1x1x32xf32> to vector<2x8x32xf32>
    %22 = arith.mulf %19, %21 : vector<2x8x32xf32>
    %c0_10 = arith.constant 0 : index
    %c0_11 = arith.constant 0 : index
    %c0_12 = arith.constant 0 : index
    %23 = vector.load %arg3[%c0_10, %c0_11, %c0_12] : memref<1x1x32xf32, #tpu.memory_space<vmem>>, vector<1x1x32xf32>
    %24 = vector.broadcast %23 : vector<1x1x32xf32> to vector<2x8x32xf32>
    %25 = arith.addf %22, %24 : vector<2x8x32xf32>
    %c0_13 = arith.constant 0 : index
    %c0_14 = arith.constant 0 : index
    %26 = vector.load %arg7[%c0_13, %c0_14] : memref<2x32xf32, #tpu.memory_space<vmem>>, vector<2x32xf32>
    %cst_15 = arith.constant dense<0.000000e+00> : vector<2x32xf32>
    %27 = vector.multi_reduction <add>, %25, %cst_15 [1] : vector<2x8x32xf32> to vector<2x32xf32>
    %28 = arith.addf %26, %27 : vector<2x32xf32>
    %c0_16 = arith.constant 0 : index
    %c0_17 = arith.constant 0 : index
    %29 = vector.load %arg7[%c0_16, %c0_17] : memref<2x32xf32, #tpu.memory_space<vmem>>, vector<2x32xf32>
    tpu.vector_store %arg7[%c0_16, %c0_17], %28 {strides = array<i32>} : memref<2x32xf32, #tpu.memory_space<vmem>>, vector<2x32xf32>,
    %c0_i32_18 = arith.constant 0 : i32
    %30 = arith.cmpi eq, %arg0, %c0_i32_18 : i32
    %31 = arith.extui %30 : i1 to i32
    %c0_i32_19 = arith.constant 0 : i32
    %32 = arith.cmpi ne, %31, %c0_i32_19 : i32
    scf.if %32 {
      %c0_20 = arith.constant 0 : index
      %c0_21 = arith.constant 0 : index
      %33 = vector.load %arg7[%c0_20, %c0_21] : memref<2x32xf32, #tpu.memory_space<vmem>>, vector<2x32xf32>
      %cst_22 = arith.constant 1.250000e-01 : f32
      %34 = vector.broadcast %cst_22 : f32 to vector<2x32xf32>
      %35 = arith.mulf %33, %34 : vector<2x32xf32>
      %36 = arith.truncf %35 : vector<2x32xf32> to vector<2x32xbf16>
      %c0_23 = arith.constant 0 : index
      %c0_24 = arith.constant 0 : index
      %37 = vector.load %arg4[%c0_23, %c0_24] : memref<32x11xf32, #tpu.memory_space<vmem>>, vector<32x11xf32>
      %38 = arith.truncf %37 : vector<32x11xf32> to vector<32x11xbf16>
      %cst_25 = arith.constant dense<0.000000e+00> : vector<2x11xf32>
      %39 = tpu.matmul %36, %38, %cst_25 {dimension_numbers = #tpu.dot_dimension_numbers<[1], [0], [0], [1], [0, 0, 1, 1], [], []>} : vector<2x32xbf16>, vector<32x11xbf16>, vector<2x11xf32> -> vector<2x11xf32>
      %c0_26 = arith.constant 0 : index
      %c0_27 = arith.constant 0 : index
      %40 = vector.load %arg5[%c0_26, %c0_27] : memref<1x11xf32, #tpu.memory_space<vmem>>, vector<1x11xf32>
      %41 = vector.broadcast %40 : vector<1x11xf32> to vector<2x11xf32>
      %42 = arith.addf %39, %41 : vector<2x11xf32>
      %c0_28 = arith.constant 0 : index
      %c0_29 = arith.constant 0 : index
      %43 = vector.load %arg6[%c0_28, %c0_29] : memref<2x11xf32, #tpu.memory_space<vmem>>, vector<2x11xf32>
      tpu.vector_store %arg6[%c0_28, %c0_29], %42 {strides = array<i32>} : memref<2x11xf32, #tpu.memory_space<vmem>>, vector<2x11xf32>,
    } else {
    }
    return
  }
  func.func @transform_0(%arg0: i32) -> (i32, i32, i32) {
    %c0_i32 = arith.constant 0 : i32
    %c0_i32_0 = arith.constant 0 : i32
    %c0_i32_1 = arith.constant 0 : i32
    return %c0_i32, %arg0, %c0_i32_0 : i32, i32, i32
  }
  func.func @transform_1(%arg0: i32) -> (i32, i32, i32) {
    %c0_i32 = arith.constant 0 : i32
    %c0_i32_0 = arith.constant 0 : i32
    %c0_i32_1 = arith.constant 0 : i32
    %c0_i32_2 = arith.constant 0 : i32
    return %c0_i32, %c0_i32_0, %c0_i32_1 : i32, i32, i32
  }
  func.func @transform_2(%arg0: i32) -> (i32, i32, i32) {
    %c0_i32 = arith.constant 0 : i32
    %c0_i32_0 = arith.constant 0 : i32
    %c0_i32_1 = arith.constant 0 : i32
    %c0_i32_2 = arith.constant 0 : i32
    return %c0_i32, %c0_i32_0, %c0_i32_1 : i32, i32, i32
  }
  func.func @transform_3(%arg0: i32) -> (i32, i32) {
    %c0_i32 = arith.constant 0 : i32
    %c0_i32_0 = arith.constant 0 : i32
    %c0_i32_1 = arith.constant 0 : i32
    return %c0_i32, %c0_i32_0 : i32, i32
  }
  func.func @transform_4(%arg0: i32) -> (i32, i32) {
    %c0_i32 = arith.constant 0 : i32
    %c0_i32_0 = arith.constant 0 : i32
    %c0_i32_1 = arith.constant 0 : i32
    return %c0_i32, %c0_i32_0 : i32, i32
  }
  func.func @transform_5(%arg0: i32) -> (i32, i32) {
    %c0_i32 = arith.constant 0 : i32
    %c0_i32_0 = arith.constant 0 : i32
    %c0_i32_1 = arith.constant 0 : i32
    return %c0_i32, %c0_i32_0 : i32, i32
  }
}

</mosaic_0001>

<bundles_post_ra>
// kernel: modified_whisper_forward.13
= control target key start
LH: loop header
LB: loop body
LE: loop exit
PB: predicated region body
PF: predicated region fallthrough
CT: control target
= control target key end

     0   :  { %s453_s1 = inlined_call_operand.vmem [shape: f32[128,128], index: 1, kind: input, shape index: {}]   ;;  %s454_s0 = inlined_call_operand.vmem [shape: f32[32,128], index: 0, kind: input, shape index: {}]   ;;  %s455_s2 = inlined_call_operand.vmem [shape: f32[1,128], index: 2, kind: input, shape index: {}]   ;;  %s456_s3 = inlined_call_operand.vmem [shape: bf16[32,128], index: 3, kind: output, shape index: {}]  }
   0x1   :  { %v33_v0 = vld [vmem:[%s453_s1] sm:$0xff]  ;;  %v34_v1 = vld [vmem:[%s453_s1 + $0x8] sm:$0xff]  ;;  %v35_v2 = vld [vmem:[%s453_s1 + $0x10] sm:$0xff] }
   0x2   :  { %v49_v3 = vpack.c.bf16 %v34_v1, %v33_v0  ;;  %v36_v4 = vld [vmem:[%s453_s1 + $0x18] sm:$0xff]  ;;  %v37_v6 = vld [vmem:[%s453_s1 + $0x20] sm:$0xff]  ;;  %v38_v7 = vld [vmem:[%s453_s1 + $0x28] sm:$0xff] }
   0x3   :  { %v50_v5 = vpack.c.bf16 %v36_v4, %v35_v2  ;;  %v51_v8 = vpack.c.bf16 %v38_v7, %v37_v6  ;;  %v23_v9 = vld [vmem:[%s454_s0] sm:$0xff]  ;;  %v24_v10 = vld [vmem:[%s454_s0 + $0x8] sm:$0xff]  ;;  %v39_v11 = vld [vmem:[%s453_s1 + $0x30] sm:$0xff] }
   0x4   :  { %294 = vmatprep.subr.bf16.mxu0 %v49_v3  ;;  %v40_v12 = vld [vmem:[%s453_s1 + $0x38] sm:$0xff]  ;;  %v27_v13 = vpack.c.bf16 %v24_v10, %v23_v9  ;;  %v41_v15 = vld [vmem:[%s453_s1 + $0x40] sm:$0xff]  ;;  %v42_v16 = vld [vmem:[%s453_s1 + $0x48] sm:$0xff] }
   0x5   :  { %295 = vmatpush3.bf16.msra.mxu0 %v49_v3  ;;  %v52_v14 = vpack.c.bf16 %v40_v12, %v39_v11  ;;  %v53_v17 = vpack.c.bf16 %v42_v16, %v41_v15  ;;  %v43_v18 = vld [vmem:[%s453_s1 + $0x50] sm:$0xff]  ;;  %v44_v19 = vld [vmem:[%s453_s1 + $0x58] sm:$0xff]  ;;  %v45_v21 = vld [vmem:[%s453_s1 + $0x60] sm:$0xff] }
   0x6   :  { %296 = vmatprep.subr.bf16.mxu0 %v50_v5  ;;  %310 = vmatprep.mubr.bf16.mxu0 %v27_v13  ;;  %v54_v20 = vpack.c.bf16 %v44_v19, %v43_v18  ;;  %v46_v22 = vld [vmem:[%s453_s1 + $0x68] sm:$0xff]  ;;  %v47_v24 = vld [vmem:[%s453_s1 + $0x70] sm:$0xff]  ;;  %v48_v25 = vld [vmem:[%s453_s1 + $0x78] sm:$0xff] }
   0x7   :  { %v55_v23 = vpack.c.bf16 %v46_v22, %v45_v21  ;;  %v56_v26 = vpack.c.bf16 %v48_v25, %v47_v24  ;;  %v25_v27 = vld [vmem:[%s454_s0 + $0x10] sm:$0xff]  ;;  %v26_v28 = vld [vmem:[%s454_s0 + $0x18] sm:$0xff]  ;;  %v264_v30 = vld [vmem:[%s455_s2] ss:$0 sm:$0xff] }
   0x8   :  { %v28_v29 = vpack.c.bf16 %v26_v28, %v25_v27 }
   0x9   :  { %297 = vmatpush3.bf16.msra.mxu0 %v50_v5 }
   0xa   :  { %298 = vmatprep.subr.bf16.mxu0 %v51_v8 }
   0xd   :  { %299 = vmatpush3.bf16.msra.mxu0 %v51_v8 }
   0xe   :  { %300 = vmatprep.subr.bf16.mxu0 %v52_v14 }
  0x11   :  { %301 = vmatpush3.bf16.msra.mxu0 %v52_v14 }
  0x12   :  { %302 = vmatprep.subr.bf16.mxu0 %v53_v17 }
  0x15   :  { %303 = vmatpush3.bf16.msra.mxu0 %v53_v17 }
  0x16   :  { %304 = vmatprep.subr.bf16.mxu0 %v54_v20 }
  0x19   :  { %305 = vmatpush3.bf16.msra.mxu0 %v54_v20 }
  0x1a   :  { %306 = vmatprep.subr.bf16.mxu0 %v55_v23 }
  0x1d   :  { %307 = vmatpush3.bf16.msra.mxu0 %v55_v23 }
  0x1e   :  { %308 = vmatprep.subr.bf16.mxu0 %v56_v26 }
  0x21   :  { %309 = vmatpush3.bf16.msra.mxu0 %v56_v26 }
  0x24   :  { %311 = vmatmul.mubr.bf16.vlgmr.msra.gmra.mrb[0].mxu0 %v28_v29 }
  0xf7   :  { %v312_v31 = vpop.f32.mrb[0].mxu0 }
  0xf8   :  { %v415_v32 = vadd.f32 %v312_v31, %v264_v30  ;;  %v91_v33 = vpop.f32.mrb[1].mxu0 }
  0xf9   :  { %v417_v34 = vadd.f32 %v264_v30, %v91_v33  ;;  %v313_v35 = vpop.f32.mrb[2].mxu0 }
  0xfa   :  { %v420_v36 = vmul.f32 0.70710677, %v415_v32  ;;  %v422_v37 = vadd.f32 %v313_v35, %v264_v30  ;;  %v94_v38 = vpop.f32.mrb[3].mxu0 }
  0xfb   :  { %v425_v39 = vmul.f32 0.70710677, %v417_v34  ;;  %v431_v42 = vadd.f32 %v264_v30, %v94_v38 }
  0xfc   :  { %v150_v40 = vand.u32 2147483647, %v420_v36  ;;  %v429_v41 = vmul.f32 0.70710677, %v422_v37  ;;  %vm142_vm0 = vcmp.lt.f32.partialorder %v420_v36, 0.0 }
  0xfd   :  { %v148_v43 = vand.u32 2147483647, %v425_v39  ;;  %v436_v48 = vmul.f32 0.70710677, %v431_v42  ;;  %vm140_vm1 = vcmp.lt.f32.partialorder %v425_v39, 0.0 }
  0xfe   :  { %v154_v44 = vmul.f32 0.3275911, %v150_v40  ;;  %v151_v46 = vand.u32 2147483647, %v429_v41  ;;  %v206_v55 = vsub.f32 0.0, %v150_v40  ;;  %vm143_vm2 = vcmp.lt.f32.partialorder %v429_v41, 0.0 }
  0xff   :  { %v152_v45 = vmul.f32 0.3275911, %v148_v43  ;;  %v149_v51 = vand.u32 2147483647, %v436_v48  ;;  %v204_v56 = vsub.f32 0.0, %v148_v43  ;;  %vm141_vm3 = vcmp.lt.f32.partialorder %v436_v48, 0.0 }
 0x100   :  { %v158_v47 = vadd.f32 1.0, %v154_v44  ;;  %v155_v50 = vmul.f32 0.3275911, %v151_v46  ;;  %v210_v58 = vmul.f32 %v206_v55, %v150_v40  ;;  %v207_v59 = vsub.f32 0.0, %v151_v46 }
 0x101   :  { %v156_v49 = vadd.f32 1.0, %v152_v45  ;;  %v153_v53 = vmul.f32 0.3275911, %v149_v51  ;;  %v208_v62 = vmul.f32 %v204_v56, %v148_v43  ;;  %v205_v0 = vsub.f32 0.0, %v149_v51 }
 0x102   :  { %315 = vrcp.f32 %v158_v47  ;;  %v159_v52 = vadd.f32 1.0, %v155_v50  ;;  %v216_v3 = vmul.f32 1.442695, %v210_v58  ;;  %v211_v5 = vmul.f32 %v207_v59, %v151_v46 }
 0x103   :  { %317 = vrcp.f32 %v156_v49  ;;  %v157_v54 = vadd.f32 1.0, %v153_v53  ;;  %v212_v7 = vmul.f32 1.442695, %v208_v62  ;;  %v209_v11 = vmul.f32 %v205_v0, %v149_v51 }
 0x104   :  { %319 = vrcp.f32 %v159_v52  ;;  %v218_v16 = vmul.f32 1.442695, %v211_v5  ;;  %v331_v56 = vmov 1.0   ;;  %v134_v5 = vmul.f32 0.5, %v415_v32 }
 0x105   :  { %321 = vrcp.f32 %v157_v54  ;;  %v214_v21 = vmul.f32 1.442695, %v209_v11  ;;  %v146_v58 = vsel %vm142_vm0, -1.0, %v331_v56  ;;  %v144_v36 = vsel %vm140_vm1, -1.0, %v331_v56 }
 0x106   :  { %323 = vpow2.f32 %v216_v3  ;;  %v147_v3 = vsel %vm143_vm2, -1.0, %v331_v56 }
 0x107   :  { %325 = vpow2.f32 %v212_v7 }
 0x108   :  { %327 = vpow2.f32 %v218_v16 }
 0x109   :  { %329 = vpow2.f32 %v214_v21 }
 0x10c   :  { %v316_v57 = vpop.eup %315 }
 0x10d   :  { %v318_v60 = vpop.eup %317  ;;  %v170_v61 = vmul.f32 1.0614054, %v316_v57 }
 0x10e   :  { %v168_v63 = vmul.f32 1.0614054, %v318_v60  ;;  %v320_v2 = vpop.eup %319 }
 0x10f   :  { %v174_v1 = vadd.f32 -1.4531521, %v170_v61  ;;  %v171_v8 = vmul.f32 1.0614054, %v320_v2  ;;  %v322_v9 = vpop.eup %321 }
 0x110   :  { %v172_v4 = vadd.f32 -1.4531521, %v168_v63  ;;  %v169_v14 = vmul.f32 1.0614054, %v322_v9  ;;  %v324_v44 = vpop.eup %323 }
 0x111   :  { %v178_v6 = vmul.f32 %v316_v57, %v174_v1  ;;  %v175_v13 = vadd.f32 -1.4531521, %v171_v8  ;;  %v326_v46 = vpop.eup %325  ;;  %v135_v8 = vmul.f32 0.5, %v422_v37 }
 0x112   :  { %v176_v10 = vmul.f32 %v318_v60, %v172_v4  ;;  %v173_v19 = vadd.f32 -1.4531521, %v169_v14  ;;  %v328_v55 = vpop.eup %327 }
 0x113   :  { %v182_v12 = vadd.f32 1.4214138, %v178_v6  ;;  %v179_v18 = vmul.f32 %v320_v2, %v175_v13  ;;  %v330_v62 = vpop.eup %329  ;;  %v145_v6 = vsel %vm141_vm3, -1.0, %v331_v56  ;;  %v133_v13 = vmul.f32 0.5, %v431_v42 }
 0x114   :  { %v180_v15 = vadd.f32 1.4214138, %v176_v10  ;;  %v177_v24 = vmul.f32 %v322_v9, %v173_v19 }
 0x115   :  { %v186_v17 = vmul.f32 %v316_v57, %v182_v12  ;;  %v183_v23 = vadd.f32 1.4214138, %v179_v18 }
 0x116   :  { %v184_v20 = vmul.f32 %v318_v60, %v180_v15  ;;  %v181_v28 = vadd.f32 1.4214138, %v177_v24 }
 0x117   :  { %v190_v22 = vadd.f32 -0.28449672, %v186_v17  ;;  %v187_v27 = vmul.f32 %v320_v2, %v183_v23 }
 0x118   :  { %v188_v25 = vadd.f32 -0.28449672, %v184_v20  ;;  %v185_v33 = vmul.f32 %v322_v9, %v181_v28 }
 0x119   :  { %v194_v26 = vmul.f32 %v316_v57, %v190_v22  ;;  %v191_v31 = vadd.f32 -0.28449672, %v187_v27 }
 0x11a   :  { %v192_v29 = vmul.f32 %v318_v60, %v188_v25  ;;  %v189_v43 = vadd.f32 -0.28449672, %v185_v33 }
 0x11b   :  { %v198_v30 = vadd.f32 0.2548296, %v194_v26  ;;  %v195_v40 = vmul.f32 %v320_v2, %v191_v31 }
 0x11c   :  { %v196_v35 = vadd.f32 0.2548296, %v192_v29  ;;  %v193_v50 = vmul.f32 %v322_v9, %v189_v43 }
 0x11d   :  { %v202_v38 = vmul.f32 %v316_v57, %v198_v30  ;;  %v199_v49 = vadd.f32 0.2548296, %v195_v40 }
 0x11e   :  { %v200_v45 = vmul.f32 %v318_v60, %v196_v35  ;;  %v197_v54 = vadd.f32 0.2548296, %v193_v50 }
 0x11f   :  { %v222_v47 = vmul.f32 %v324_v44, %v202_v38  ;;  %v203_v53 = vmul.f32 %v320_v2, %v199_v49 }
 0x120   :  { %v220_v51 = vmul.f32 %v326_v46, %v200_v45  ;;  %v201_v61 = vmul.f32 %v322_v9, %v197_v54  ;;  %v132_v9 = vmul.f32 0.5, %v417_v34 }
 0x121   :  { %v226_v52 = vsub.f32 1.0, %v222_v47  ;;  %v223_v60 = vmul.f32 %v328_v55, %v203_v53 }
 0x122   :  { %v224_v57 = vsub.f32 1.0, %v220_v51  ;;  %v221_v1 = vmul.f32 %v330_v62, %v201_v61 }
 0x123   :  { %v230_v59 = vmul.f32 %v226_v52, %v146_v58  ;;  %v227_v0 = vsub.f32 1.0, %v223_v60 }
 0x124   :  { %v228_v63 = vmul.f32 %v224_v57, %v144_v36  ;;  %v225_v4 = vsub.f32 1.0, %v221_v1 }
 0x125   :  { %v234_v39 = vadd.f32 1.0, %v230_v59  ;;  %v231_v2 = vmul.f32 %v227_v0, %v147_v3 }
 0x126   :  { %v232_v7 = vadd.f32 1.0, %v228_v63  ;;  %v229_v10 = vmul.f32 %v225_v4, %v145_v6 }
 0x127   :  { %v235_v41 = vadd.f32 1.0, %v231_v2  ;;  %v238_v11 = vmul.f32 %v234_v39, %v134_v5 }
 0x128   :  { %v233_v48 = vadd.f32 1.0, %v229_v10  ;;  %v236_v14 = vmul.f32 %v232_v7, %v132_v9 }
 0x129   :  { %v239_v12 = vmul.f32 %v235_v41, %v135_v8 }
 0x12a   :  { %v237_v16 = vmul.f32 %v233_v48, %v133_v13 }
 0x12b   :  { %v281_v15 = vpack.c.bf16 %v239_v12, %v238_v11 }
 0x12c   :  { %v276_v32 = vpack.c.bf16 %v237_v16, %v236_v14 }
 0x12d   :  { %283 = vst [vmem:[%s456_s3 + $0x8] sm:$0xff] %v281_v15  }
 0x12e   :  { %277 = vst [vmem:[%s456_s3] sm:$0xff] %v276_v32  }

// kernel: modified_whisper_forward.14
= control target key start
LH: loop header
LB: loop body
LE: loop exit
PB: predicated region body
PF: predicated region fallthrough
CT: control target
= control target key end

     0   :  { %v217_v0 = vmov 0.0   ;;  %vm218_vm0 = vmmov 0   ;;  %s300_s1 = inlined_call_operand.vmem [shape: f32[128,128], index: 1, kind: input, shape index: {}]   ;;  %s301_s0 = inlined_call_operand.vmem [shape: bf16[16,128], index: 0, kind: input, shape index: {}]   ;;  %s302_s2 = inlined_call_operand.vmem [shape: f32[1,128], index: 2, kind: input, shape index: {}]   ;;  %s303_s3 = inlined_call_operand.vmem [shape: f32[16,128], index: 3, kind: output, shape index: {}]  }
   0x1   :  { %185 = vmatprep.subr.bf16.mxu0 %v217_v0  ;;  %v25_v1 = vld [vmem:[%s300_s1] sm:$0xff]  ;;  %v26_v2 = vld [vmem:[%s300_s1 + $0x8] sm:$0xff]  ;;  %v27_v3 = vld [vmem:[%s300_s1 + $0x10] sm:$0xff]  ;;  %201 = vmatprep.mubr.msk.bf16.mxu0 %vm218_vm0, %v217_v0 }
   0x2   :  { %v41_v4 = vpack.c.bf16 %v26_v2, %v25_v1  ;;  %v28_v5 = vld [vmem:[%s300_s1 + $0x18] sm:$0xff]  ;;  %v29_v7 = vld [vmem:[%s300_s1 + $0x20] sm:$0xff]  ;;  %v30_v8 = vld [vmem:[%s300_s1 + $0x28] sm:$0xff] }
   0x3   :  { %v42_v6 = vpack.c.bf16 %v28_v5, %v27_v3  ;;  %v43_v9 = vpack.c.bf16 %v30_v8, %v29_v7  ;;  %v31_v10 = vld [vmem:[%s300_s1 + $0x30] sm:$0xff]  ;;  %v32_v11 = vld [vmem:[%s300_s1 + $0x38] sm:$0xff]  ;;  %v33_v13 = vld [vmem:[%s300_s1 + $0x40] sm:$0xff]  ;;  %v219_v7 = vmov 1.0  }
   0x4   :  { %186 = vmatpush3.bf16.msra.mxu0 %v41_v4  ;;  %v44_v12 = vpack.c.bf16 %v32_v11, %v31_v10  ;;  %v34_v14 = vld [vmem:[%s300_s1 + $0x48] sm:$0xff]  ;;  %v35_v16 = vld [vmem:[%s300_s1 + $0x50] sm:$0xff]  ;;  %v36_v17 = vld [vmem:[%s300_s1 + $0x58] sm:$0xff] }
   0x5   :  { %187 = vmatprep.subr.bf16.mxu0 %v217_v0  ;;  %v45_v15 = vpack.c.bf16 %v34_v14, %v33_v13  ;;  %v46_v18 = vpack.c.bf16 %v36_v17, %v35_v16  ;;  %v37_v19 = vld [vmem:[%s300_s1 + $0x60] sm:$0xff]  ;;  %v38_v20 = vld [vmem:[%s300_s1 + $0x68] sm:$0xff]  ;;  %v39_v22 = vld [vmem:[%s300_s1 + $0x70] sm:$0xff] }
   0x6   :  { %v47_v21 = vpack.c.bf16 %v38_v20, %v37_v19  ;;  %v40_v23 = vld [vmem:[%s300_s1 + $0x78] sm:$0xff]  ;;  %v208_v25 = vld [vmem:[%s301_s0] sm:$0xff]  }
   0x7   :  { %v48_v24 = vpack.c.bf16 %v40_v23, %v39_v22  ;;  %v175_v26 = vld [vmem:[%s302_s2] ss:$0 sm:$0xff] }
   0x8   :  { %188 = vmatpush3.bf16.msra.mxu0 %v42_v6 }
   0x9   :  { %189 = vmatprep.subr.bf16.mxu0 %v217_v0 }
   0xc   :  { %190 = vmatpush3.bf16.msra.mxu0 %v43_v9 }
   0xd   :  { %191 = vmatprep.subr.bf16.mxu0 %v217_v0 }
  0x10   :  { %192 = vmatpush3.bf16.msra.mxu0 %v44_v12 }
  0x11   :  { %193 = vmatprep.subr.bf16.mxu0 %v217_v0 }
  0x14   :  { %194 = vmatpush3.bf16.msra.mxu0 %v45_v15 }
  0x15   :  { %195 = vmatprep.subr.bf16.mxu0 %v217_v0 }
  0x18   :  { %196 = vmatpush3.bf16.msra.mxu0 %v46_v18 }
  0x19   :  { %197 = vmatprep.subr.bf16.mxu0 %v217_v0 }
  0x1c   :  { %198 = vmatpush3.bf16.msra.mxu0 %v47_v21 }
  0x1d   :  { %199 = vmatprep.subr.bf16.mxu0 %v217_v0 }
  0x20   :  { %200 = vmatpush3.bf16.msra.mxu0 %v48_v24 }
  0x23   :  { %202 = vmatmul.mubr.bf16.vlgmr.msra.gmra.mrb[0].mxu0 %v208_v25 }
  0xf6   :  { %v89_v27 = vpop.f32.mrb[0].mxu0 }
  0xf7   :  { %v112_v28 = vadd.f32 %v175_v26, %v89_v27  ;;  %v203_v29 = vpop.f32.mrb[1].mxu0 }
  0xf8   :  { %v92_v30 = vpop.f32.mrb[2].mxu0 }
  0xf9   :  { %v116_v31 = vmul.f32 0.70710677, %v112_v28  ;;  %v113_v32 = vadd.f32 %v175_v26, %v92_v30  ;;  %v204_v33 = vpop.f32.mrb[3].mxu0  ;;  %v114_v12 = vmul.f32 0.5, %v112_v28 }
  0xfb   :  { %v122_v34 = vand.u32 2147483647, %v116_v31  ;;  %v117_v35 = vmul.f32 0.70710677, %v113_v32  ;;  %vm118_vm1 = vcmp.lt.f32.partialorder %v116_v31, 0.0  ;;  %v115_v17 = vmul.f32 0.5, %v113_v32 }
  0xfc   :  { %v120_v8 = vsel %vm118_vm1, -1.0, %v219_v7 }
  0xfd   :  { %v124_v36 = vmul.f32 0.3275911, %v122_v34  ;;  %v123_v37 = vand.u32 2147483647, %v117_v35  ;;  %v150_v41 = vsub.f32 0.0, %v122_v34  ;;  %vm119_vm2 = vcmp.lt.f32.partialorder %v117_v35, 0.0 }
  0xfe   :  { %v121_v14 = vsel %vm119_vm2, -1.0, %v219_v7 }
  0xff   :  { %v126_v38 = vadd.f32 1.0, %v124_v36  ;;  %v125_v39 = vmul.f32 0.3275911, %v123_v37  ;;  %v151_v42 = vsub.f32 0.0, %v123_v37  ;;  %v152_v44 = vmul.f32 %v150_v41, %v122_v34 }
 0x101   :  { %209 = vrcp.f32 %v126_v38  ;;  %v127_v40 = vadd.f32 1.0, %v125_v39  ;;  %v153_v48 = vmul.f32 %v151_v42, %v123_v37  ;;  %v154_v49 = vmul.f32 1.442695, %v152_v44 }
 0x103   :  { %211 = vrcp.f32 %v127_v40  ;;  %v156_v54 = vmul.f32 1.442695, %v153_v48 }
 0x104   :  { %213 = vpow2.f32 %v154_v49 }
 0x105   :  { %215 = vpow2.f32 %v156_v54 }
 0x10b   :  { %v210_v43 = vpop.eup %209 }
 0x10c   :  { %v132_v45 = vmul.f32 1.0614054, %v210_v43 }
 0x10d   :  { %v212_v46 = vpop.eup %211 }
 0x10e   :  { %v134_v47 = vadd.f32 -1.4531521, %v132_v45  ;;  %v133_v50 = vmul.f32 1.0614054, %v212_v46  ;;  %v214_v1 = vpop.eup %213 }
 0x10f   :  { %v216_v5 = vpop.eup %215 }
 0x110   :  { %v136_v51 = vmul.f32 %v210_v43, %v134_v47  ;;  %v135_v52 = vadd.f32 -1.4531521, %v133_v50 }
 0x112   :  { %v138_v53 = vadd.f32 1.4214138, %v136_v51  ;;  %v137_v55 = vmul.f32 %v212_v46, %v135_v52 }
 0x114   :  { %v140_v56 = vmul.f32 %v210_v43, %v138_v53  ;;  %v139_v57 = vadd.f32 1.4214138, %v137_v55 }
 0x116   :  { %v142_v58 = vadd.f32 -0.28449672, %v140_v56  ;;  %v141_v59 = vmul.f32 %v212_v46, %v139_v57 }
 0x118   :  { %v144_v60 = vmul.f32 %v210_v43, %v142_v58  ;;  %v143_v61 = vadd.f32 -0.28449672, %v141_v59 }
 0x11a   :  { %v146_v62 = vadd.f32 0.2548296, %v144_v60  ;;  %v145_v63 = vmul.f32 %v212_v46, %v143_v61 }
 0x11c   :  { %v148_v0 = vmul.f32 %v210_v43, %v146_v62  ;;  %v147_v2 = vadd.f32 0.2548296, %v145_v63 }
 0x11e   :  { %v158_v3 = vmul.f32 %v214_v1, %v148_v0  ;;  %v149_v4 = vmul.f32 %v212_v46, %v147_v2 }
 0x120   :  { %v160_v6 = vsub.f32 1.0, %v158_v3  ;;  %v159_v9 = vmul.f32 %v216_v5, %v149_v4 }
 0x122   :  { %v162_v10 = vmul.f32 %v160_v6, %v120_v8  ;;  %v161_v11 = vsub.f32 1.0, %v159_v9 }
 0x124   :  { %v164_v13 = vadd.f32 1.0, %v162_v10  ;;  %v163_v15 = vmul.f32 %v161_v11, %v121_v14 }
 0x126   :  { %v166_v16 = vmul.f32 %v164_v13, %v114_v12  ;;  %v165_v18 = vadd.f32 1.0, %v163_v15 }
 0x128   :  { %168 = vst [vmem:[%s303_s3] sm:$0xff] %v166_v16  ;;  %v167_v19 = vmul.f32 %v165_v18, %v115_v17 }
 0x12a   :  { %169 = vst [vmem:[%s303_s3 + $0x8] sm:$0xff] %v167_v19 }

// kernel: modified_whisper_forward.17
= control target key start
LH: loop header
LB: loop body
LE: loop exit
PB: predicated region body
PF: predicated region fallthrough
CT: control target
= control target key end

     0   :  { %v161_v0 = vmov 0.0   ;;  %vm162_vm0 = vmmov 0   ;;  %s254_s1 = inlined_call_operand.vmem [shape: f32[128,128], index: 1, kind: input, shape index: {}]   ;;  %s255_s0 = inlined_call_operand.vmem [shape: bf16[16,128], index: 0, kind: input, shape index: {}]   ;;  %s256_s2 = inlined_call_operand.vmem [shape: f32[1,128], index: 2, kind: input, shape index: {}]   ;;  %s257_s3 = inlined_call_operand.vmem [shape: f32[16,128], index: 3, kind: input, shape index: {}]   ;;  %s258_s4 = inlined_call_operand.vmem [shape: f32[16,128], index: 4, kind: output, shape index: {}]  }
   0x1   :  { %138 = vmatprep.subr.bf16.mxu0 %v161_v0  ;;  %v28_v1 = vld [vmem:[%s254_s1] sm:$0xff]  ;;  %v29_v2 = vld [vmem:[%s254_s1 + $0x8] sm:$0xff]  ;;  %v30_v3 = vld [vmem:[%s254_s1 + $0x10] sm:$0xff]  ;;  %154 = vmatprep.mubr.msk.bf16.mxu0 %vm162_vm0, %v161_v0 }
   0x2   :  { %v44_v4 = vpack.c.bf16 %v29_v2, %v28_v1  ;;  %v31_v5 = vld [vmem:[%s254_s1 + $0x18] sm:$0xff]  ;;  %v32_v7 = vld [vmem:[%s254_s1 + $0x20] sm:$0xff]  ;;  %v33_v8 = vld [vmem:[%s254_s1 + $0x28] sm:$0xff] }
   0x3   :  { %v45_v6 = vpack.c.bf16 %v31_v5, %v30_v3  ;;  %v46_v9 = vpack.c.bf16 %v33_v8, %v32_v7  ;;  %v34_v10 = vld [vmem:[%s254_s1 + $0x30] sm:$0xff]  ;;  %v35_v11 = vld [vmem:[%s254_s1 + $0x38] sm:$0xff]  ;;  %v36_v13 = vld [vmem:[%s254_s1 + $0x40] sm:$0xff] }
   0x4   :  { %139 = vmatpush3.bf16.msra.mxu0 %v44_v4  ;;  %v47_v12 = vpack.c.bf16 %v35_v11, %v34_v10  ;;  %v37_v14 = vld [vmem:[%s254_s1 + $0x48] sm:$0xff]  ;;  %v38_v16 = vld [vmem:[%s254_s1 + $0x50] sm:$0xff]  ;;  %v39_v17 = vld [vmem:[%s254_s1 + $0x58] sm:$0xff] }
   0x5   :  { %140 = vmatprep.subr.bf16.mxu0 %v161_v0  ;;  %v48_v15 = vpack.c.bf16 %v37_v14, %v36_v13  ;;  %v49_v18 = vpack.c.bf16 %v39_v17, %v38_v16  ;;  %v40_v19 = vld [vmem:[%s254_s1 + $0x60] sm:$0xff]  ;;  %v41_v20 = vld [vmem:[%s254_s1 + $0x68] sm:$0xff]  ;;  %v42_v22 = vld [vmem:[%s254_s1 + $0x70] sm:$0xff] }
   0x6   :  { %v50_v21 = vpack.c.bf16 %v41_v20, %v40_v19  ;;  %v43_v23 = vld [vmem:[%s254_s1 + $0x78] sm:$0xff]  ;;  %v160_v25 = vld [vmem:[%s255_s0] sm:$0xff]   ;;  %v118_v32 = vld [vmem:[%s257_s3 + $0x8] sm:$0xff] }
   0x7   :  { %v51_v24 = vpack.c.bf16 %v43_v23, %v42_v22  ;;  %v128_v26 = vld [vmem:[%s256_s2] ss:$0 sm:$0xff] }
   0x8   :  { %141 = vmatpush3.bf16.msra.mxu0 %v45_v6  ;;  %v117_v28 = vld [vmem:[%s257_s3] sm:$0xff] }
   0x9   :  { %142 = vmatprep.subr.bf16.mxu0 %v161_v0 }
   0xc   :  { %143 = vmatpush3.bf16.msra.mxu0 %v46_v9 }
   0xd   :  { %144 = vmatprep.subr.bf16.mxu0 %v161_v0 }
  0x10   :  { %145 = vmatpush3.bf16.msra.mxu0 %v47_v12 }
  0x11   :  { %146 = vmatprep.subr.bf16.mxu0 %v161_v0 }
  0x14   :  { %147 = vmatpush3.bf16.msra.mxu0 %v48_v15 }
  0x15   :  { %148 = vmatprep.subr.bf16.mxu0 %v161_v0 }
  0x18   :  { %149 = vmatpush3.bf16.msra.mxu0 %v49_v18 }
  0x19   :  { %150 = vmatprep.subr.bf16.mxu0 %v161_v0 }
  0x1c   :  { %151 = vmatpush3.bf16.msra.mxu0 %v50_v21 }
  0x1d   :  { %152 = vmatprep.subr.bf16.mxu0 %v161_v0 }
  0x20   :  { %153 = vmatpush3.bf16.msra.mxu0 %v51_v24 }
  0x23   :  { %155 = vmatmul.mubr.bf16.vlgmr.msra.gmra.mrb[0].mxu0 %v160_v25 }
  0xf6   :  { %v92_v27 = vpop.f32.mrb[0].mxu0 }
  0xf7   :  { %v115_v29 = vadd.f32 %v128_v26, %v92_v27  ;;  %v156_v30 = vpop.f32.mrb[1].mxu0 }
  0xf8   :  { %v95_v31 = vpop.f32.mrb[2].mxu0 }
  0xf9   :  { %v119_v33 = vadd.f32 %v117_v28, %v115_v29  ;;  %v116_v34 = vadd.f32 %v128_v26, %v95_v31  ;;  %v157_v35 = vpop.f32.mrb[3].mxu0 }
  0xfb   :  { %121 = vst [vmem:[%s258_s4] sm:$0xff] %v119_v33  ;;  %v120_v36 = vadd.f32 %v118_v32, %v116_v34 }
  0xfd   :  { %122 = vst [vmem:[%s258_s4 + $0x8] sm:$0xff] %v120_v36 }

// kernel: modified_whisper_forward.15
= control target key start
LH: loop header
LB: loop body
LE: loop exit
PB: predicated region body
PF: predicated region fallthrough
CT: control target
= control target key end

     0   :  { %v227_v2 = vmov 0.0   ;;  %v41_v6 = vlaneseq  ;;  %vm228_vm1 = vmmov 0   ;;  %s325_s0 = inlined_call_operand.vmem [shape: f32[16,128], index: 0, kind: input, shape index: {}]   ;;  %s326_s1 = inlined_call_operand.vmem [shape: f32[128,128], index: 1, kind: input, shape index: {}]   ;;  %s327_s3 = inlined_call_operand.vmem [shape: f32[1,128], index: 3, kind: input, shape index: {}]   ;;  %s328_s4 = inlined_call_operand.vmem [shape: f32[1,128], index: 4, kind: input, shape index: {}]   ;;  %s329_s2 = inlined_call_operand.vmem [shape: f32[1,128], index: 2, kind: input, shape index: {}]   ;;  %s330_s5 = inlined_call_operand.vmem [shape: bf16[16,128], index: 5, kind: output, shape index: {}]  }
   0x1   :  { %v31_v0 = vld [vmem:[%s325_s0] sm:$0xff]  ;;  %v32_v1 = vld [vmem:[%s325_s0 + $0x8] sm:$0xff]  ;;  %201 = vmatprep.subr.bf16.mxu0 %v227_v2  ;;  %v85_v18 = vld [vmem:[%s326_s1 + $0x10] sm:$0xff]  ;;  %217 = vmatprep.mubr.msk.bf16.mxu0 %vm228_vm1, %v227_v2 }
   0x2   :  { %33 = vadd.xlane.f32.xlu0 %v31_v0  ;;  %v83_v3 = vld [vmem:[%s326_s1] sm:$0xff]  ;;  %v84_v4 = vld [vmem:[%s326_s1 + $0x8] sm:$0xff]  ;;  %v42_v7 = vand.u32 127, %v41_v6  ;;  %v86_v19 = vld [vmem:[%s326_s1 + $0x18] sm:$0xff] }
   0x3   :  { %v99_v5 = vpack.c.bf16 %v84_v4, %v83_v3  ;;  %v100_v20 = vpack.c.bf16 %v86_v19, %v85_v18  ;;  %v87_v21 = vld [vmem:[%s326_s1 + $0x20] sm:$0xff]  ;;  %v88_v22 = vld [vmem:[%s326_s1 + $0x28] sm:$0xff]  ;;  %v89_v24 = vld [vmem:[%s326_s1 + $0x30] sm:$0xff] }
   0x4   :  { %vm43_vm0 = vcmp.lt.s32.totalorder %v42_v7, 32  ;;  %v101_v23 = vpack.c.bf16 %v88_v22, %v87_v21  ;;  %v90_v25 = vld [vmem:[%s326_s1 + $0x38] sm:$0xff]  ;;  %v91_v27 = vld [vmem:[%s326_s1 + $0x40] sm:$0xff]  ;;  %v92_v28 = vld [vmem:[%s326_s1 + $0x48] sm:$0xff] }
   0x5   :  { %202 = vmatpush3.bf16.msra.mxu0 %v99_v5  ;;  %v102_v26 = vpack.c.bf16 %v90_v25, %v89_v24  ;;  %v103_v29 = vpack.c.bf16 %v92_v28, %v91_v27  ;;  %v93_v30 = vld [vmem:[%s326_s1 + $0x50] sm:$0xff]  ;;  %v94_v31 = vld [vmem:[%s326_s1 + $0x58] sm:$0xff]  ;;  %v95_v33 = vld [vmem:[%s326_s1 + $0x60] sm:$0xff] }
   0x6   :  { %35 = vadd.xlane.f32.xlu0 %v32_v1  ;;  %203 = vmatprep.subr.bf16.mxu0 %v227_v2  ;;  %v104_v32 = vpack.c.bf16 %v94_v31, %v93_v30  ;;  %v96_v34 = vld [vmem:[%s326_s1 + $0x68] sm:$0xff]  ;;  %v97_v36 = vld [vmem:[%s326_s1 + $0x70] sm:$0xff]  ;;  %v98_v37 = vld [vmem:[%s326_s1 + $0x78] sm:$0xff] }
   0x7   :  { %v105_v35 = vpack.c.bf16 %v96_v34, %v95_v33  ;;  %v106_v38 = vpack.c.bf16 %v98_v37, %v97_v36  ;;  %v180_v47 = vld [vmem:[%s327_s3] ss:$0 sm:$0xff] }
   0x8   :  { %v181_v51 = vld [vmem:[%s328_s4] ss:$0 sm:$0xff] }
   0x9   :  { %204 = vmatpush3.bf16.msra.mxu0 %v100_v20  ;;  %v182_v57 = vld [vmem:[%s329_s2] ss:$0 sm:$0xff] }
   0xa   :  { %205 = vmatprep.subr.bf16.mxu0 %v227_v2 }
   0xd   :  { %206 = vmatpush3.bf16.msra.mxu0 %v101_v23 }
   0xe   :  { %207 = vmatprep.subr.bf16.mxu0 %v227_v2 }
  0x11   :  { %208 = vmatpush3.bf16.msra.mxu0 %v102_v26 }
  0x12   :  { %209 = vmatprep.subr.bf16.mxu0 %v227_v2 }
  0x15   :  { %210 = vmatpush3.bf16.msra.mxu0 %v103_v29 }
  0x16   :  { %211 = vmatprep.subr.bf16.mxu0 %v227_v2 }
  0x19   :  { %212 = vmatpush3.bf16.msra.mxu0 %v104_v32 }
  0x1a   :  { %213 = vmatprep.subr.bf16.mxu0 %v227_v2 }
  0x1d   :  { %214 = vmatpush3.bf16.msra.mxu0 %v105_v35 }
  0x1e   :  { %215 = vmatprep.subr.bf16.mxu0 %v227_v2 }
  0x21   :  { %216 = vmatpush3.bf16.msra.mxu0 %v106_v38 }
  0x8f   :  { %v34_v8 = vpop.xlane.xlu0 %33 }
  0x90   :  { %v37_v9 = vmul.f32 0.03125, %v34_v8 }
  0x92   :  { %v39_v10 = vsub.f32 %v31_v0, %v37_v9 }
  0x93   :  { %v36_v11 = vpop.xlane.xlu0 %35 }
  0x94   :  { %v38_v12 = vmul.f32 0.03125, %v36_v11  ;;  %v44_v13 = vsel %vm43_vm0, %v39_v10, 0.0 }
  0x95   :  { %v46_v14 = vmul.f32 %v44_v13, %v44_v13 }
  0x96   :  { %v40_v15 = vsub.f32 %v32_v1, %v38_v12 }
  0x97   :  { %48 = vadd.xlane.f32.xlu1 %v46_v14 }
  0x98   :  { %v45_v16 = vsel %vm43_vm0, %v40_v15, 0.0 }
  0x99   :  { %v47_v17 = vmul.f32 %v45_v16, %v45_v16 }
  0x9b   :  { %50 = vadd.xlane.f32.xlu1 %v47_v17 }
 0x124   :  { %v49_v39 = vpop.xlane.xlu1 %48 }
 0x125   :  { %v52_v40 = vmul.f32 0.03125, %v49_v39 }
 0x127   :  { %v54_v41 = vadd.f32 1e-05, %v52_v40 }
 0x128   :  { %v51_v42 = vpop.xlane.xlu1 %50 }
 0x129   :  { %223 = vrsqrt.f32 %v54_v41  ;;  %v53_v43 = vmul.f32 0.03125, %v51_v42 }
 0x12b   :  { %v55_v44 = vadd.f32 1e-05, %v53_v43 }
 0x12d   :  { %225 = vrsqrt.f32 %v55_v44 }
 0x133   :  { %v224_v45 = vpop.eup %223 }
 0x134   :  { %v58_v46 = vmul.f32 %v224_v45, %v44_v13 }
 0x136   :  { %v67_v50 = vmul.f32 %v180_v47, %v58_v46 }
 0x137   :  { %v226_v48 = vpop.eup %225 }
 0x138   :  { %v59_v49 = vmul.f32 %v226_v48, %v45_v16  ;;  %v76_v53 = vadd.f32 %v181_v51, %v67_v50 }
 0x13a   :  { %v68_v52 = vmul.f32 %v180_v47, %v59_v49 }
 0x13c   :  { %v77_v54 = vadd.f32 %v181_v51, %v68_v52 }
 0x13e   :  { %v78_v55 = vpack.c.bf16 %v77_v54, %v76_v53 }
 0x140   :  { %218 = vmatmul.mubr.bf16.vlgmr.msra.gmra.mrb[0].mxu0 %v78_v55 }
 0x213   :  { %v141_v56 = vpop.f32.mrb[0].mxu0 }
 0x214   :  { %v219_v58 = vpop.f32.mrb[1].mxu0  ;;  %v164_v60 = vadd.f32 %v182_v57, %v141_v56 }
 0x215   :  { %v144_v59 = vpop.f32.mrb[2].mxu0 }
 0x216   :  { %v165_v61 = vadd.f32 %v182_v57, %v144_v59  ;;  %v220_v62 = vpop.f32.mrb[3].mxu0 }
 0x218   :  { %v190_v63 = vpack.c.bf16 %v165_v61, %v164_v60 }
 0x21a   :  { %191 = vst [vmem:[%s330_s5] sm:$0xff] %v190_v63  }

// kernel: modified_whisper_forward.16
= control target key start
LH: loop header
LB: loop body
LE: loop exit
PB: predicated region body
PF: predicated region fallthrough
CT: control target
= control target key end

     0   :  { %s987_s12 = smov 0   ;;  %s989_s13 = smov 0   ;;  %s1098_s0 = inlined_call_operand.vmem [shape: bf16[2,8,32], index: 0, kind: input, shape index: {}]   ;;  %s1099_s1 = inlined_call_operand.vmem [shape: bf16[2,8,32], index: 1, kind: input, shape index: {}]   ;;  %s1100_s2 = inlined_call_operand.vmem [shape: bf16[2,8,32], index: 2, kind: input, shape index: {}]   ;;  %s1101_s3 = inlined_call_operand.vmem [shape: bf16[2,8,32], index: 3, kind: output, shape index: {}]  }
   0x1   :  { %s991_s14 = smov 0  }
   0x2 LB: > { %s25_s15 = sadd.s32 1, %s953_s13  ;;  %p802_p0 = scmp.ge.s32.totalorder %s957_s14, 1  ;;  %s957_s14 = sphi %s991_s14, %s13_s14   ;;  %s953_s13 = sphi %s989_s13, %s1103_s13   ;;  %s949_s12 = sphi %s987_s12, %s1102_s12  }
   0x3   : > { %p27_p1 = scmp.ge.s32.totalorder %s25_s15, 2  ;;  %p173_p2 = scmp.lt.s32.totalorder %s957_s14, 3 }
   0x5   : > { %s1105_s15 = smov (%p27_p1, %s25_s15), 0  ;;  %p174_p3 = pnand %p802_p0, %p173_p2 }
   0x6   : > { %p209_p4 = scmp.lt.s32.totalorder (!%p174_p3), %s949_s12, 1  ;;  %v959_v0 = vmov (!%p174_p3), 0.0   ;;  %vm960_vm0 = vmmov (!%p174_p3), 0   ;;  %vm235_vm1 = vcmask (!%p174_p3), 64512   ;;  %s961_s23 = smov (!%p174_p3), 120   ;;  %vm295_vm2 = vcmask (!%p174_p3), 1043456  }
   0x7   : > { %177 = sbr.rel (%p174_p3) target bundleno = 1164 (0x48c), region = 32  ;;  %836 = vmatprep.subr.bf16.mxu0 (!%p174_p3), %v959_v0  ;;  %838 = vmatprep.mubr.msk.bf16.mxu0 (!%p174_p3), %vm960_vm0, %v959_v0  ;;  %s962_s24 = smov (!%p174_p3), 112   ;;  %vm693_vm3 = vcmask (!%p174_p3), 130048   ;;  %vm695_vm4 = vcmask (!%p174_p3), 195584   ;;  %vm698_vm5 = vcmask (!%p174_p3), 257024  }
   0x8   : > { %842 = vmatprep.subr.bf16.mxu1 (!%p174_p3), %v959_v0  ;;  %844 = vmatprep.mubr.msk.bf16.mxu1 (!%p174_p3), %vm960_vm0, %v959_v0  ;;  %s963_s25 = smov (!%p174_p3), 104   ;;  %s964_s29 = smov (!%p174_p3), 8  }
   0x9   : > { %s965_s30 = smov (!%p174_p3), 16   ;;  %s966_s4 = smov (!%p174_p3), 24  }
   0xe   : > { %s1107_s12 = smov (!%p209_p4, %s949_s12), 1 }
   0xf   : > { %s1011_s16 = sshll.u32 %s1107_s12, 2 }
  0x10   : > { %s219_s19 = scalar_lea.vmem %s1099_s1, %s1011_s16  ;;  %s215_s22 = scalar_lea.vmem %s1098_s0, %s1011_s16 }
  0x11   : > { %v233_v1 = vld [vmem:[%s219_s19] sm:$0xf]  ;;  %s223_s28 = scalar_lea.vmem %s1100_s2, %s1011_s16  ;;  %s230_s7 = scalar_lea.vmem %s1101_s3, %s1011_s16 }
  0x12   : > { %v240_v2 = vsel %vm235_vm1, %v233_v1, 0  ;;  %v232_v3 = vld [vmem:[%s215_s22] sm:$0xf]  ;;  %v810_v5 = vcombine.low %v233_v1, %v233_v1 }
  0x13   : > { %837 = vmatpush3.bf16.xpose.msra.mxu0 %v240_v2  ;;  %v809_v4 = vcombine.low %v232_v3, %v232_v3  ;;  %v234_v11 = vld [vmem:[%s223_s28] sm:$0xf] }
  0x14   : > { %854 = vmatprep.subr.bf16.mxu0 %v959_v0  ;;  %v297_v12 = vsel %vm295_vm2, %v234_v11, 0  ;;  %v812_v41 = vcombine.low %v234_v11, %v234_v11 }
  0x15   : > { %344 = vrot.lane.b32.xlu1 %v809_v4, %s961_s23  ;;  %843 = vmatpush3.bf16.msra.mxu1 %v297_v12 }
  0x16   : > { %848 = vmatprep.subr.bf16.mxu1 %v959_v0 }
  0x19   : > { %462 = vrot.lane.b32.xlu1 %v810_v5, %s962_s24 }
  0x1a   : > { %839 = vmatmul.mubr.msk.bf16.vlgmr.msra.gmra.mrb[0].mxu0 %vm235_vm1, %v232_v3 }
  0x1b   : > { %856 = vmatprep.mubr.msk.bf16.mxu0 %vm960_vm0, %v959_v0 }
  0x1d   : > { %460 = vrot.lane.b32.xlu1 %v809_v4, %s962_s24 }
  0x21   : > { %572 = vrot.lane.b32.xlu1 %v810_v5, %s963_s25 }
  0x25   : > { %570 = vrot.lane.b32.xlu1 %v809_v4, %s963_s25 }
  0x87   : > { %v345_v18 = vpop.permute.xlu1 %344 }
  0x8b   : > { %v463_v21 = vpop.permute.xlu1 %462 }
  0x8c   : > { %v468_v22 = vsel %vm235_vm1, %v463_v21, 0 }
  0x8f   : > { %v461_v23 = vpop.permute.xlu1 %460 }
  0x93   : > { %v573_v24 = vpop.permute.xlu1 %572 }
  0x94   : > { %v578_v25 = vsel %vm235_vm1, %v573_v24, 0 }
  0x97   : > { %v571_v26 = vpop.permute.xlu1 %570 }
  0xed   : > { %v276_v6 = vpop.f32.mrb[0].mxu0 }
  0xee   : > { %v840_v7 = vpop.f32.mrb[1].mxu0  ;;  %v282_v8 = vsel %vm235_vm1, %v276_v6, -inf }
  0xef   : > { %283 = vmax.xlane.f32.xlu0 %v282_v8  ;;  %v279_v9 = vpop.f32.mrb[2].mxu0 }
  0xf0   : > { %v841_v10 = vpop.f32.mrb[3].mxu0 }
 0x105   : > { %349 = vrot.lane.b32.xlu0 %v810_v5, %s961_s23 }
 0x17c   : > { %v284_v13 = vpop.xlane.xlu0 %283 }
 0x17d   : > { %v285_v14 = vsub.f32 %v276_v6, %v284_v13 }
 0x17f   : > { %v286_v15 = vmul.f32 1.442695, %v285_v14 }
 0x180   : > { %v350_v16 = vpop.permute.xlu0 %349 }
 0x181   : > { %919 = vpow2.f32 %v286_v15  ;;  %v355_v19 = vsel %vm235_vm1, %v350_v16, 0 }
 0x18b   : > { %v1039_v17 = vpop.eup %919 }
 0x18c   : > { %v291_v20 = vpack.c.bf16 %v1039_v17, %v1039_v17  ;;  %v288_v8 = vsel %vm235_vm1, %v1039_v17, 0.0 }
 0x18e   : > { %845 = vmatmul.mubr.msk.bf16.vlgmr.msra.gmra.mrb[0].mxu1 %vm235_vm1, %v291_v20 }
 0x18f   : > { %849 = vmatpush3.bf16.xpose.msra.mxu1 %v355_v19  ;;  %850 = vmatprep.mubr.msk.bf16.mxu1 %vm960_vm0, %v959_v0 }
 0x190   : > { %860 = vmatprep.subr.bf16.mxu1 %v959_v0 }
 0x196   : > { %851 = vmatmul.mubr.msk.bf16.vlgmr.msra.gmra.mrb[4].mxu1 %vm235_vm1, %v345_v18 }
 0x197   : > { %861 = vmatpush3.bf16.xpose.msra.mxu1 %v468_v22  ;;  %862 = vmatprep.mubr.msk.bf16.mxu1 %vm960_vm0, %v959_v0 }
 0x198   : > { %872 = vmatprep.subr.bf16.mxu1 %v959_v0 }
 0x19e   : > { %863 = vmatmul.mubr.msk.bf16.vlgmr.msra.gmra.mrb[8].mxu1 %vm235_vm1, %v461_v23 }
 0x19f   : > { %873 = vmatpush3.bf16.xpose.msra.mxu1 %v578_v25  ;;  %874 = vmatprep.mubr.msk.bf16.mxu1 %vm960_vm0, %v959_v0 }
 0x1a6   : > { %875 = vmatmul.mubr.msk.bf16.vlgmr.msra.gmra.mrb[12].mxu1 %vm235_vm1, %v571_v26 }
 0x261   : > { %v1058_v27 = vpop.f32.mrb[0].mxu1 }
 0x262   : > { %v846_v28 = vpop.f32.mrb[1].mxu1 }
 0x263   : > { %v336_v29 = vpop.f32.mrb[2].mxu1 }
 0x264   : > { %v847_v30 = vpop.f32.mrb[3].mxu1 }
 0x269   : > { %v391_v31 = vpop.f32.mrb[4].mxu1 }
 0x26a   : > { %v852_v32 = vpop.f32.mrb[5].mxu1  ;;  %v397_v33 = vsel %vm235_vm1, %v391_v31, -inf }
 0x26b   : > { %398 = vmax.xlane.f32.xlu1 %v397_v33  ;;  %v394_v34 = vpop.f32.mrb[6].mxu1 }
 0x26c   : > { %v853_v35 = vpop.f32.mrb[7].mxu1 }
 0x271   : > { %v504_v36 = vpop.f32.mrb[8].mxu1 }
 0x272   : > { %v510_v37 = vsel %vm235_vm1, %v504_v36, -inf  ;;  %v864_v38 = vpop.f32.mrb[9].mxu1 }
 0x273   : > { %511 = vmax.xlane.f32.xlu0 %v510_v37  ;;  %v507_v39 = vpop.f32.mrb[10].mxu1 }
 0x274   : > { %v865_v40 = vpop.f32.mrb[11].mxu1 }
 0x279   : > { %v614_v42 = vpop.f32.mrb[12].mxu1 }
 0x27a   : > { %v876_v43 = vpop.f32.mrb[13].mxu1  ;;  %v620_v46 = vsel %vm235_vm1, %v614_v42, -inf }
 0x27b   : > { %v617_v44 = vpop.f32.mrb[14].mxu1 }
 0x27c   : > { %520 = vrot.lane.b32.xlu1 %v812_v41, %s962_s24  ;;  %v877_v45 = vpop.f32.mrb[15].mxu1 }
 0x289   : > { %410 = vrot.lane.b32.xlu0 %v812_v41, %s961_s23 }
 0x2a0   : > { %621 = vmax.xlane.f32.xlu1 %v620_v46 }
 0x2b1   : > { %630 = vrot.lane.b32.xlu1 %v812_v41, %s963_s25 }
 0x2f8   : > { %v399_v47 = vpop.xlane.xlu1 %398 }
 0x2f9   : > { %v400_v48 = vsub.f32 %v391_v31, %v399_v47 }
 0x2fb   : > { %v401_v49 = vmul.f32 1.442695, %v400_v48 }
 0x2fc   : > { %v521_v56 = vpop.permute.xlu1 %520 }
 0x2fd   : > { %921 = vpow2.f32 %v401_v49  ;;  %v526_v59 = vsel %vm295_vm2, %v521_v56, 0 }
 0x300   : > { %v512_v50 = vpop.xlane.xlu0 %511 }
 0x301   : > { %v513_v51 = vsub.f32 %v504_v36, %v512_v50 }
 0x303   : > { %v514_v52 = vmul.f32 1.442695, %v513_v51 }
 0x304   : > { %v411_v53 = vpop.permute.xlu0 %410 }
 0x305   : > { %923 = vpow2.f32 %v514_v52  ;;  %v416_v54 = vsel %vm295_vm2, %v411_v53, 0 }
 0x306   : > { %855 = vmatpush3.bf16.msra.mxu0 %v416_v54 }
 0x307   : > { %v922_v55 = vpop.eup %921  ;;  %866 = vmatprep.subr.bf16.mxu0 %v959_v0 }
 0x308   : > { %v403_v57 = vsel %vm235_vm1, %v922_v55, 0.0  ;;  %v406_v58 = vpack.c.bf16 %v922_v55, %v922_v55 }
 0x309   : > { %404 = vadd.xlane.f32.xlu0 %v403_v57 }
 0x30a   : > { %857 = vmatmul.mubr.msk.bf16.vlgmr.msra.gmra.mrb[4].mxu0 %vm235_vm1, %v406_v58 }
 0x30b   : > { %867 = vmatpush3.bf16.msra.mxu0 %v526_v59  ;;  %868 = vmatprep.mubr.msk.bf16.mxu0 %vm960_vm0, %v959_v0 }
 0x30c   : > { %878 = vmatprep.subr.bf16.mxu0 %v959_v0 }
 0x30f   : > { %v924_v60 = vpop.eup %923 }
 0x310   : > { %v516_v61 = vsel %vm235_vm1, %v924_v60, 0.0  ;;  %v519_v62 = vpack.c.bf16 %v924_v60, %v924_v60 }
 0x311   : > { %517 = vadd.xlane.f32.xlu1 %v516_v61 }
 0x312   : > { %869 = vmatmul.mubr.msk.bf16.vlgmr.msra.gmra.mrb[8].mxu0 %vm235_vm1, %v519_v62 }
 0x313   : > { %880 = vmatprep.mubr.msk.bf16.mxu0 %vm960_vm0, %v959_v0 }
 0x32d   : > { %v622_v63 = vpop.xlane.xlu1 %621 }
 0x32e   : > { %v623_v1 = vsub.f32 %v614_v42, %v622_v63 }
 0x330   : > { %v624_v2 = vmul.f32 1.442695, %v623_v1 }
 0x331   : > { %v631_v3 = vpop.permute.xlu1 %630 }
 0x332   : > { %925 = vpow2.f32 %v624_v2  ;;  %v636_v4 = vsel %vm295_vm2, %v631_v3, 0 }
 0x333   : > { %879 = vmatpush3.bf16.msra.mxu0 %v636_v4 }
 0x33c   : > { %v926_v5 = vpop.eup %925 }
 0x33d   : > { %v626_v6 = vsel %vm235_vm1, %v926_v5, 0.0  ;;  %v629_v7 = vpack.c.bf16 %v926_v5, %v926_v5 }
 0x33e   : > { %627 = vadd.xlane.f32.xlu0 %v626_v6 }
 0x33f   : > { %881 = vmatmul.mubr.msk.bf16.vlgmr.msra.gmra.mrb[12].mxu0 %vm235_vm1, %v629_v7 }
 0x342   : > { %289 = vadd.xlane.f32.xlu0 %v288_v8 }
 0x396   : > { %v405_v0 = vpop.xlane.xlu0 %404 }
 0x397   : > { %927 = vrcp.f32 %v405_v0 }
 0x39e   : > { %v518_v9 = vpop.xlane.xlu1 %517 }
 0x39f   : > { %929 = vrcp.f32 %v518_v9 }
 0x3a1   : > { %v928_v10 = vpop.eup %927 }
 0x3a9   : > { %v930_v16 = vpop.eup %929 }
 0x3cb   : > { %v628_v22 = vpop.xlane.xlu0 %627 }
 0x3cc   : > { %931 = vrcp.f32 %v628_v22 }
 0x3cf   : > { %v290_v30 = vpop.xlane.xlu0 %289 }
 0x3d0   : > { %933 = vrcp.f32 %v290_v30 }
 0x3d6   : > { %v932_v23 = vpop.eup %931 }
 0x3da   : > { %v934_v31 = vpop.eup %933 }
 0x3db   : > { %v340_v33 = vmul.f32 %v934_v31, %v1058_v27 }
 0x3dd   : > { %v452_v11 = vpop.f32.mrb[4].mxu0 }
 0x3de   : > { %v459_v12 = vmul.f32 %v928_v10, %v452_v11  ;;  %v858_v13 = vpop.f32.mrb[5].mxu0 }
 0x3df   : > { %v455_v14 = vpop.f32.mrb[6].mxu0 }
 0x3e0   : > { %681 = vrot.lane.b32.xlu1 %v459_v12, %s964_s29  ;;  %v859_v15 = vpop.f32.mrb[7].mxu0 }
 0x3e5   : > { %v562_v18 = vpop.f32.mrb[8].mxu0 }
 0x3e6   : > { %v569_v19 = vmul.f32 %v930_v16, %v562_v18  ;;  %v870_v20 = vpop.f32.mrb[9].mxu0 }
 0x3e7   : > { %v565_v21 = vpop.f32.mrb[10].mxu0 }
 0x3e8   : > { %685 = vrot.lane.b32.xlu0 %v569_v19, %s965_s30  ;;  %v871_v17 = vpop.f32.mrb[11].mxu0 }
 0x412   : > { %v672_v24 = vpop.f32.mrb[12].mxu0 }
 0x413   : > { %v679_v25 = vmul.f32 %v932_v23, %v672_v24  ;;  %v882_v26 = vpop.f32.mrb[13].mxu0 }
 0x414   : > { %v675_v28 = vpop.f32.mrb[14].mxu0 }
 0x415   : > { %689 = vrot.lane.b32.xlu1 %v679_v25, %s966_s4  ;;  %v883_v29 = vpop.f32.mrb[15].mxu0 }
 0x452   : > { %v682_v32 = vpop.permute.xlu1 %681 }
 0x453   : > { %v692_v35 = vsel %vm235_vm1, %v340_v33, %v682_v32 }
 0x45a   : > { %v686_v34 = vpop.permute.xlu0 %685 }
 0x45b   : > { %v694_v36 = vsel %vm693_vm3, %v692_v35, %v686_v34 }
 0x487   : > { %v690_v37 = vpop.permute.xlu1 %689 }
 0x488   : > { %v696_v38 = vsel %vm695_vm4, %v694_v36, %v690_v37 }
 0x489   : > { %v697_v39 = vpack.c.bf16 %v696_v38, %v696_v38 }
 0x48b   : > { %699 = vst.msk [vmem:[%s230_s7] sm:$0xf] %vm698_vm5, %v697_v39 }
 0x48c PF: > { %s13_s14 = sadd.s32 1, %s957_s14   ;;  %s1102_s12 = smov %s953_s13 }
 0x48d   : > { %p10_p5 = scmp.ge.s32.totalorder %s13_s14, 4   ;;  %s1103_s13 = smov %s1105_s15 }
 0x48f   :  { %12 = sbr.rel (!%p10_p5) target bundleno = 2 (0x2), region = 68 }

// kernel: modified_whisper_forward.18
= control target key start
LH: loop header
LB: loop body
LE: loop exit
PB: predicated region body
PF: predicated region fallthrough
CT: control target
= control target key end

     0   :  { %v290_v2 = vmov 0.0   ;;  %v41_v6 = vlaneseq  ;;  %vm291_vm1 = vmmov 0   ;;  %s389_s0 = inlined_call_operand.vmem [shape: f32[16,128], index: 0, kind: input, shape index: {}]   ;;  %s390_s1 = inlined_call_operand.vmem [shape: f32[128,128], index: 1, kind: input, shape index: {}]   ;;  %s391_s3 = inlined_call_operand.vmem [shape: f32[1,128], index: 3, kind: input, shape index: {}]   ;;  %s392_s4 = inlined_call_operand.vmem [shape: f32[1,128], index: 4, kind: input, shape index: {}]   ;;  %s393_s2 = inlined_call_operand.vmem [shape: f32[1,128], index: 2, kind: input, shape index: {}]   ;;  %s394_s5 = inlined_call_operand.vmem [shape: bf16[16,128], index: 5, kind: output, shape index: {}]  }
   0x1   :  { %v31_v0 = vld [vmem:[%s389_s0] sm:$0xff]  ;;  %v32_v1 = vld [vmem:[%s389_s0 + $0x8] sm:$0xff]  ;;  %255 = vmatprep.subr.bf16.mxu0 %v290_v2  ;;  %v85_v18 = vld [vmem:[%s390_s1 + $0x10] sm:$0xff]  ;;  %271 = vmatprep.mubr.msk.bf16.mxu0 %vm291_vm1, %v290_v2 }
   0x2   :  { %33 = vadd.xlane.f32.xlu0 %v31_v0  ;;  %v83_v3 = vld [vmem:[%s390_s1] sm:$0xff]  ;;  %v84_v4 = vld [vmem:[%s390_s1 + $0x8] sm:$0xff]  ;;  %v42_v7 = vand.u32 127, %v41_v6  ;;  %v86_v19 = vld [vmem:[%s390_s1 + $0x18] sm:$0xff] }
   0x3   :  { %v99_v5 = vpack.c.bf16 %v84_v4, %v83_v3  ;;  %v100_v20 = vpack.c.bf16 %v86_v19, %v85_v18  ;;  %v87_v21 = vld [vmem:[%s390_s1 + $0x20] sm:$0xff]  ;;  %v88_v22 = vld [vmem:[%s390_s1 + $0x28] sm:$0xff]  ;;  %v89_v24 = vld [vmem:[%s390_s1 + $0x30] sm:$0xff] }
   0x4   :  { %vm43_vm0 = vcmp.lt.s32.totalorder %v42_v7, 32  ;;  %v101_v23 = vpack.c.bf16 %v88_v22, %v87_v21  ;;  %v90_v25 = vld [vmem:[%s390_s1 + $0x38] sm:$0xff]  ;;  %v91_v27 = vld [vmem:[%s390_s1 + $0x40] sm:$0xff]  ;;  %v92_v28 = vld [vmem:[%s390_s1 + $0x48] sm:$0xff] }
   0x5   :  { %256 = vmatpush3.bf16.msra.mxu0 %v99_v5  ;;  %v102_v26 = vpack.c.bf16 %v90_v25, %v89_v24  ;;  %v103_v29 = vpack.c.bf16 %v92_v28, %v91_v27  ;;  %v93_v30 = vld [vmem:[%s390_s1 + $0x50] sm:$0xff]  ;;  %v94_v31 = vld [vmem:[%s390_s1 + $0x58] sm:$0xff]  ;;  %v95_v33 = vld [vmem:[%s390_s1 + $0x60] sm:$0xff] }
   0x6   :  { %35 = vadd.xlane.f32.xlu0 %v32_v1  ;;  %257 = vmatprep.subr.bf16.mxu0 %v290_v2  ;;  %v104_v32 = vpack.c.bf16 %v94_v31, %v93_v30  ;;  %v96_v34 = vld [vmem:[%s390_s1 + $0x68] sm:$0xff]  ;;  %v97_v36 = vld [vmem:[%s390_s1 + $0x70] sm:$0xff]  ;;  %v98_v37 = vld [vmem:[%s390_s1 + $0x78] sm:$0xff] }
   0x7   :  { %v105_v35 = vpack.c.bf16 %v96_v34, %v95_v33  ;;  %v106_v38 = vpack.c.bf16 %v98_v37, %v97_v36  ;;  %v234_v47 = vld [vmem:[%s391_s3] ss:$0 sm:$0xff]  ;;  %v292_v37 = vmov 1.0  }
   0x8   :  { %v235_v51 = vld [vmem:[%s392_s4] ss:$0 sm:$0xff] }
   0x9   :  { %258 = vmatpush3.bf16.msra.mxu0 %v100_v20  ;;  %v236_v56 = vld [vmem:[%s393_s2] ss:$0 sm:$0xff] }
   0xa   :  { %259 = vmatprep.subr.bf16.mxu0 %v290_v2 }
   0xd   :  { %260 = vmatpush3.bf16.msra.mxu0 %v101_v23 }
   0xe   :  { %261 = vmatprep.subr.bf16.mxu0 %v290_v2 }
  0x11   :  { %262 = vmatpush3.bf16.msra.mxu0 %v102_v26 }
  0x12   :  { %263 = vmatprep.subr.bf16.mxu0 %v290_v2 }
  0x15   :  { %264 = vmatpush3.bf16.msra.mxu0 %v103_v29 }
  0x16   :  { %265 = vmatprep.subr.bf16.mxu0 %v290_v2 }
  0x19   :  { %266 = vmatpush3.bf16.msra.mxu0 %v104_v32 }
  0x1a   :  { %267 = vmatprep.subr.bf16.mxu0 %v290_v2 }
  0x1d   :  { %268 = vmatpush3.bf16.msra.mxu0 %v105_v35 }
  0x1e   :  { %269 = vmatprep.subr.bf16.mxu0 %v290_v2 }
  0x21   :  { %270 = vmatpush3.bf16.msra.mxu0 %v106_v38 }
  0x8f   :  { %v34_v8 = vpop.xlane.xlu0 %33 }
  0x90   :  { %v37_v9 = vmul.f32 0.03125, %v34_v8 }
  0x92   :  { %v39_v10 = vsub.f32 %v31_v0, %v37_v9 }
  0x93   :  { %v36_v11 = vpop.xlane.xlu0 %35 }
  0x94   :  { %v38_v12 = vmul.f32 0.03125, %v36_v11  ;;  %v44_v13 = vsel %vm43_vm0, %v39_v10, 0.0 }
  0x95   :  { %v46_v14 = vmul.f32 %v44_v13, %v44_v13 }
  0x96   :  { %v40_v15 = vsub.f32 %v32_v1, %v38_v12 }
  0x97   :  { %48 = vadd.xlane.f32.xlu1 %v46_v14 }
  0x98   :  { %v45_v16 = vsel %vm43_vm0, %v40_v15, 0.0 }
  0x99   :  { %v47_v17 = vmul.f32 %v45_v16, %v45_v16 }
  0x9b   :  { %50 = vadd.xlane.f32.xlu1 %v47_v17 }
 0x124   :  { %v49_v39 = vpop.xlane.xlu1 %48 }
 0x125   :  { %v52_v40 = vmul.f32 0.03125, %v49_v39 }
 0x127   :  { %v54_v41 = vadd.f32 1e-05, %v52_v40 }
 0x128   :  { %v51_v42 = vpop.xlane.xlu1 %50 }
 0x129   :  { %278 = vrsqrt.f32 %v54_v41  ;;  %v53_v43 = vmul.f32 0.03125, %v51_v42 }
 0x12b   :  { %v55_v44 = vadd.f32 1e-05, %v53_v43 }
 0x12d   :  { %280 = vrsqrt.f32 %v55_v44 }
 0x133   :  { %v279_v45 = vpop.eup %278 }
 0x134   :  { %v58_v46 = vmul.f32 %v279_v45, %v44_v13 }
 0x136   :  { %v67_v50 = vmul.f32 %v234_v47, %v58_v46 }
 0x137   :  { %v281_v48 = vpop.eup %280 }
 0x138   :  { %v59_v49 = vmul.f32 %v281_v48, %v45_v16  ;;  %v76_v53 = vadd.f32 %v235_v51, %v67_v50 }
 0x13a   :  { %v68_v52 = vmul.f32 %v234_v47, %v59_v49 }
 0x13c   :  { %v77_v54 = vadd.f32 %v235_v51, %v68_v52 }
 0x13e   :  { %v78_v55 = vpack.c.bf16 %v77_v54, %v76_v53 }
 0x140   :  { %272 = vmatmul.mubr.bf16.vlgmr.msra.gmra.mrb[0].mxu0 %v78_v55 }
 0x213   :  { %v141_v57 = vpop.f32.mrb[0].mxu0 }
 0x214   :  { %v164_v58 = vadd.f32 %v236_v56, %v141_v57  ;;  %v273_v59 = vpop.f32.mrb[1].mxu0 }
 0x215   :  { %v144_v60 = vpop.f32.mrb[2].mxu0 }
 0x216   :  { %v168_v61 = vmul.f32 0.70710677, %v164_v58  ;;  %v165_v62 = vadd.f32 %v236_v56, %v144_v60  ;;  %v274_v63 = vpop.f32.mrb[3].mxu0  ;;  %v166_v45 = vmul.f32 0.5, %v164_v58 }
 0x218   :  { %v174_v0 = vand.u32 2147483647, %v168_v61  ;;  %v169_v1 = vmul.f32 0.70710677, %v165_v62  ;;  %vm170_vm2 = vcmp.lt.f32.partialorder %v168_v61, 0.0  ;;  %v167_v46 = vmul.f32 0.5, %v165_v62 }
 0x219   :  { %v172_v38 = vsel %vm170_vm2, -1.0, %v292_v37 }
 0x21a   :  { %v176_v2 = vmul.f32 0.3275911, %v174_v0  ;;  %v175_v3 = vand.u32 2147483647, %v169_v1  ;;  %v202_v7 = vsub.f32 0.0, %v174_v0  ;;  %vm171_vm3 = vcmp.lt.f32.partialorder %v169_v1, 0.0 }
 0x21b   :  { %v173_v42 = vsel %vm171_vm3, -1.0, %v292_v37 }
 0x21c   :  { %v178_v4 = vadd.f32 1.0, %v176_v2  ;;  %v177_v5 = vmul.f32 0.3275911, %v175_v3  ;;  %v203_v8 = vsub.f32 0.0, %v175_v3  ;;  %v204_v10 = vmul.f32 %v202_v7, %v174_v0 }
 0x21e   :  { %282 = vrcp.f32 %v178_v4  ;;  %v179_v6 = vadd.f32 1.0, %v177_v5  ;;  %v205_v14 = vmul.f32 %v203_v8, %v175_v3  ;;  %v206_v15 = vmul.f32 1.442695, %v204_v10 }
 0x220   :  { %284 = vrcp.f32 %v179_v6  ;;  %v208_v20 = vmul.f32 1.442695, %v205_v14 }
 0x221   :  { %286 = vpow2.f32 %v206_v15 }
 0x222   :  { %288 = vpow2.f32 %v208_v20 }
 0x228   :  { %v283_v9 = vpop.eup %282 }
 0x229   :  { %v184_v11 = vmul.f32 1.0614054, %v283_v9 }
 0x22a   :  { %v285_v12 = vpop.eup %284 }
 0x22b   :  { %v186_v13 = vadd.f32 -1.4531521, %v184_v11  ;;  %v185_v16 = vmul.f32 1.0614054, %v285_v12  ;;  %v287_v31 = vpop.eup %286 }
 0x22c   :  { %v289_v35 = vpop.eup %288 }
 0x22d   :  { %v188_v17 = vmul.f32 %v283_v9, %v186_v13  ;;  %v187_v18 = vadd.f32 -1.4531521, %v185_v16 }
 0x22f   :  { %v190_v19 = vadd.f32 1.4214138, %v188_v17  ;;  %v189_v21 = vmul.f32 %v285_v12, %v187_v18 }
 0x231   :  { %v192_v22 = vmul.f32 %v283_v9, %v190_v19  ;;  %v191_v23 = vadd.f32 1.4214138, %v189_v21 }
 0x233   :  { %v194_v24 = vadd.f32 -0.28449672, %v192_v22  ;;  %v193_v25 = vmul.f32 %v285_v12, %v191_v23 }
 0x235   :  { %v196_v26 = vmul.f32 %v283_v9, %v194_v24  ;;  %v195_v27 = vadd.f32 -0.28449672, %v193_v25 }
 0x237   :  { %v198_v28 = vadd.f32 0.2548296, %v196_v26  ;;  %v197_v29 = vmul.f32 %v285_v12, %v195_v27 }
 0x239   :  { %v200_v30 = vmul.f32 %v283_v9, %v198_v28  ;;  %v199_v32 = vadd.f32 0.2548296, %v197_v29 }
 0x23b   :  { %v210_v33 = vmul.f32 %v287_v31, %v200_v30  ;;  %v201_v34 = vmul.f32 %v285_v12, %v199_v32 }
 0x23d   :  { %v212_v36 = vsub.f32 1.0, %v210_v33  ;;  %v211_v39 = vmul.f32 %v289_v35, %v201_v34 }
 0x23f   :  { %v214_v40 = vmul.f32 %v212_v36, %v172_v38  ;;  %v213_v41 = vsub.f32 1.0, %v211_v39 }
 0x241   :  { %v216_v43 = vadd.f32 1.0, %v214_v40  ;;  %v215_v44 = vmul.f32 %v213_v41, %v173_v42 }
 0x243   :  { %v217_v47 = vadd.f32 1.0, %v215_v44  ;;  %v218_v48 = vmul.f32 %v216_v43, %v166_v45 }
 0x245   :  { %v219_v49 = vmul.f32 %v217_v47, %v167_v46 }
 0x247   :  { %v244_v50 = vpack.c.bf16 %v219_v49, %v218_v48 }
 0x249   :  { %245 = vst [vmem:[%s394_s5] sm:$0xff] %v244_v50  }

// kernel: modified_whisper_forward.25
= control target key start
LH: loop header
LB: loop body
LE: loop exit
PB: predicated region body
PF: predicated region fallthrough
CT: control target
= control target key end

     0   :  { %vm30_vm0 = vcmask 261120   ;;  %s303_s0 = inlined_call_operand.vmem [shape: f32[2,8,32], index: 0, kind: input, shape index: {}]   ;;  %s304_s1 = inlined_call_operand.vmem [shape: f32[1,1,32], index: 1, kind: input, shape index: {}]   ;;  %s305_s2 = inlined_call_operand.vmem [shape: f32[1,1,32], index: 2, kind: input, shape index: {}]   ;;  %s306_s3 = inlined_call_operand.vmem [shape: f32[32,11], index: 3, kind: input, shape index: {}]   ;;  %s307_s4 = inlined_call_operand.vmem [shape: f32[1,11], index: 4, kind: input, shape index: {}]   ;;  %s308_s5 = inlined_call_operand.hbm [shape: f32[2,11], index: 5, kind: output, shape index: {}]  }
   0x1   :  { %v28_v0 = vld [vmem:[%s303_s0] sm:$0xff]  ;;  %v29_v1 = vld [vmem:[%s303_s0 + $0x8] sm:$0xff] }
   0x2   :  { %10 = vsyncpa [#allocation4], 0  ;;  %v31_v2 = vsel %vm30_vm0, %v28_v0, 0.0  ;;  %v34_v3 = vsel %vm30_vm0, %v29_v1, 0.0  ;;  %vm26_vm1 = vcmask 254976   ;;  %v222_v14 = vmov 0.0  }
   0x3   :  { %32 = vadd.xlane.f32.xlu0 %v31_v2  ;;  %27 = vst.msk [vmem:[#allocation2] sm:$0x3] %vm26_vm1, %v222_v14  ;;  %183 = vmatprep.subr.bf16.mxu0 %v222_v14  ;;  %v104_v15 = vld [vmem:[%s306_s3] sm:$0xff]  ;;  %v105_v16 = vld [vmem:[%s306_s3 + $0x8] sm:$0xff]  ;;  %v106_v17 = vld [vmem:[%s306_s3 + $0x10] sm:$0xff]  ;;  %vm223_vm2 = vmmov 0  }
   0x4   :  { %v108_v18 = vpack.c.bf16 %v105_v16, %v104_v15  ;;  %v107_v19 = vld [vmem:[%s306_s3 + $0x18] sm:$0xff]  ;;  %187 = vmatprep.mubr.msk.bf16.mxu0 %vm223_vm2, %v222_v14  ;;  %v176_v28 = vld [vmem:[%s304_s1] ss:$0 sm:$0xff]  ;;  %vm92_vm3 = vcmask 1041409   ;;  %s224_s7 = smov [#allocation3]   ;;  %vm160_vm4 = vcmask 82944  }
   0x5   :  { %v109_v20 = vpack.c.bf16 %v107_v19, %v106_v17  ;;  %v177_v30 = vld [vmem:[%s305_s2] ss:$0 sm:$0xff]  ;;  %s168_s8 = sshll.u32 %s224_s7, 4  ;;  %s169_s8 = int_to_ptr.vmem [resolvable:$true] %s168_s8 }
   0x6   :  { %184 = vmatpush3.bf16.msra.mxu0 %v108_v18  ;;  %v178_v57 = vld [vmem:[%s307_s4] ss:$0 sm:$0xff]  ;;  %s198_s9 = scalar_lea.vmem %s169_s8, 32  ;;  %p203_p1 = scmp.lt.s32.totalorder %s169_s8, %s169_s8 }
   0x7   :  { %35 = vadd.xlane.f32.xlu0 %v34_v3  ;;  %185 = vmatprep.subr.bf16.mxu0 %v222_v14  ;;  %p199_p0 = scmp.ne.s32.totalorder %s169_s8, %s198_s9  ;;  %p204_p2 = scmp.lt.s32.totalorder %s198_s9, %s198_s9 }
   0x9   :  { %p205_p3 = por %p204_p2, %p203_p1 }
   0xa   :  { %186 = vmatpush3.bf16.msra.mxu0 %v109_v20  ;;  %v75_v49 = vld [vmem:[#allocation2] sm:$0x3] }
   0xb   :  { %p206_p4 = pnand %p205_p3, %p199_p0 }
  0x90   :  { %v33_v4 = vpop.xlane.xlu0 %32 }
  0x91   :  { %v37_v5 = vmul.f32 0.03125, %v33_v4 }
  0x93   :  { %v39_v6 = vsub.f32 %v28_v0, %v37_v5 }
  0x94   :  { %v36_v7 = vpop.xlane.xlu0 %35 }
  0x95   :  { %v38_v8 = vmul.f32 0.03125, %v36_v7  ;;  %v41_v9 = vmul.f32 %v39_v6, %v39_v6 }
  0x97   :  { %v40_v10 = vsub.f32 %v29_v1, %v38_v8  ;;  %v43_v11 = vsel %vm30_vm0, %v41_v9, 0.0 }
  0x98   :  { %44 = vadd.xlane.f32.xlu1 %v43_v11 }
  0x99   :  { %v42_v12 = vmul.f32 %v40_v10, %v40_v10 }
  0x9b   :  { %v46_v13 = vsel %vm30_vm0, %v42_v12, 0.0 }
  0x9c   :  { %47 = vadd.xlane.f32.xlu1 %v46_v13 }
 0x125   :  { %v45_v21 = vpop.xlane.xlu1 %44 }
 0x126   :  { %v49_v22 = vmul.f32 0.03125, %v45_v21 }
 0x128   :  { %v51_v23 = vadd.f32 1e-05, %v49_v22 }
 0x129   :  { %v48_v24 = vpop.xlane.xlu1 %47 }
 0x12a   :  { %194 = vrsqrt.f32 %v51_v23  ;;  %v50_v25 = vmul.f32 0.03125, %v48_v24 }
 0x12c   :  { %v52_v26 = vadd.f32 1e-05, %v50_v25 }
 0x12e   :  { %196 = vrsqrt.f32 %v52_v26 }
 0x134   :  { %v195_v27 = vpop.eup %194 }
 0x135   :  { %v55_v29 = vmul.f32 %v195_v27, %v39_v6 }
 0x137   :  { %v64_v31 = vmul.f32 %v176_v28, %v55_v29 }
 0x138   :  { %v197_v32 = vpop.eup %196 }
 0x139   :  { %v73_v33 = vadd.f32 %v177_v30, %v64_v31  ;;  %v56_v34 = vmul.f32 %v197_v32, %v40_v10 }
 0x13b   :  { %v76_v35 = vsel %vm30_vm0, %v73_v33, 0.0  ;;  %v65_v36 = vmul.f32 %v176_v28, %v56_v34 }
 0x13c   :  { %v77_v37 = vrot.slane %v76_v35, 4 }
 0x13d   :  { %v74_v38 = vadd.f32 %v177_v30, %v65_v36 }
 0x13e   :  { %v78_v39 = vadd.f32 %v77_v37, %v76_v35 }
 0x13f   :  { %v83_v40 = vsel %vm30_vm0, %v74_v38, 0.0 }
 0x140   :  { %v79_v41 = vrot.slane %v78_v39, 2  ;;  %v84_v42 = vrot.slane %v83_v40, 4 }
 0x142   :  { %v80_v43 = vadd.f32 %v79_v41, %v78_v39  ;;  %v85_v44 = vadd.f32 %v84_v42, %v83_v40 }
 0x144   :  { %v86_v45 = vrot.slane %v85_v44, 2  ;;  %v81_v46 = vrot.slane %v80_v43, 1 }
 0x146   :  { %v87_v47 = vadd.f32 %v86_v45, %v85_v44  ;;  %v82_v50 = vadd.f32 %v81_v46, %v80_v43 }
 0x148   :  { %v88_v48 = vrot.slane %v87_v47, 1 }
 0x14a   :  { %v89_v51 = vadd.f32 %v88_v48, %v87_v47 }
 0x14c   :  { %v93_v52 = vsel %vm92_vm3, %v89_v51, %v82_v50 }
 0x14d   :  { %v95_v53 = vadd.f32 %v93_v52, %v75_v49 }
 0x14f   :  { %97 = vst.msk [vmem:[#allocation2] sm:$0x3] %vm26_vm1, %v95_v53 }
 0x156   :  { %v101_v54 = vld [vmem:[#allocation2] sm:$0x3] }
 0x157   :  { %v102_v55 = vmul.f32 0.125, %v101_v54 }
 0x159   :  { %v103_v56 = vpack.c.bf16 %v102_v55, %v102_v55 }
 0x15b   :  { %188 = vmatmul.mubr.msk.bf16.vlgmr.msra.gmra.mrb[0].mxu0 %vm30_vm0, %v103_v56 }
 0x22e   :  { %v154_v58 = vpop.f32.mrb[0].mxu0 }
 0x22f   :  { %v155_v59 = vadd.f32 %v178_v57, %v154_v58  ;;  %v189_v60 = vpop.f32.mrb[1].mxu0 }
 0x230   :  { %v157_v61 = vpop.f32.mrb[2].mxu0 }
 0x231   :  { %v190_v62 = vpop.f32.mrb[3].mxu0  ;;  %161 = vst.msk [vmem:[#allocation3] sm:$0x3] %vm160_vm4, %v155_v59 }
 0x232   :  { %209 = shalt.err (!%p206_p4)
}
 0x233   :  { %s210_s4 = scalar_lea.hbm %s308_s5, 32 }
 0x234   :  { %p211_p5 = scmp.ne.s32.totalorder %s308_s5, %s210_s4  ;;  %p214_p6 = scmp.lt.u32.totalorder %s210_s4, %s308_s5 }
 0x236   :  { %p216_p7 = pnand %p214_p6, %p211_p5 }
 0x238   :  { %219 = shalt.err (!%p216_p7)
}
 0x239   :  { %171 = dma.vmem_to_hbm [thread:$0]  %s169_s8, 32, %s308_s5, [#allocation4]  }
 0x23a   :  { %220 = dma.done.wait [#allocation4], 32  }
 0x23b   :  { %221 = vsyncadd [#allocation4], 4294967264 }
 0x23c   :  { %175 = vsyncpa [#allocation4], 1 }

</bundles_post_ra>
